<compile_context>
chip_gen: v6e
topology: v6e:2x2x1
jax: 0.10.0
libtpu: 0.0.40
codegen_flags: <defaults>
</compile_context>

<pallas_src>
import functools

import jax
import jax.numpy as jnp
from jax import lax
from jax.experimental import pallas as pl
from jax.experimental.pallas import tpu as pltpu


def _ultra_conv_kernel(x_hbm, wv_ref, wh_ref, wp_ref, o_ref, xbuf, sem,
                       *, cin, tch, cout, th, wpad):
    """One (batch n, output-row-tile h) grid step.

    x_hbm : (N, Cin, Hp, Wp)    HBM (memory_space=ANY), manually DMAed
    wv_ref: (T*Cin*3,)          SMEM  folded conv0*conv1 weights  [t, ci, kh]
    wh_ref: (T*3,)              SMEM  conv2 horizontal taps       [t, kw]
    wp_ref: (Cout*T,)           SMEM  pointwise weights           [co, t]
    o_ref : (1, Cout, TH, Wp)   VMEM  output row tile (auto-pipelined)
    xbuf  : (2, Cin, TH+2, Wp)  VMEM  double-buffered input halo slab
    sem   : (2,)                DMA semaphores
    """
    n = pl.program_id(0)
    h = pl.program_id(1)
    nh = pl.num_programs(1)
    halo = th + 2
    slot = h % 2

    def slab(row_tile):
        return x_hbm.at[n, :, pl.ds(row_tile * th, halo), :]

    # Prime this batch element's first slab.  Keyed on h only, so it is correct
    # when the (parallel) batch axis is sharded across TensorCores.
    @pl.when(h == 0)
    def _():
        pltpu.make_async_copy(slab(0), xbuf.at[0], sem.at[0]).start()

    # Prefetch the next row tile into the other slot (overlaps compute below).
    @pl.when(h + 1 < nh)
    def _():
        pltpu.make_async_copy(slab(h + 1), xbuf.at[1 - slot],
                              sem.at[1 - slot]).start()

    # Wait for the current slab (descriptor shape matches its start exactly).
    pltpu.make_async_copy(slab(h), xbuf.at[slot], sem.at[slot]).wait()
    x_vmem = xbuf.at[slot]

    # ---- Stage A+B: 1x1 (Cin->T) fused with the vertical 3-tap -------------
    #   v[t] = sum_{ci,kh} w0[t,ci] * w1[t,kh] * x[ci, kh:kh+TH, :]
    # Each (ci,kh) slice is loaded once from VMEM and shared by all T accums.
    v = [jnp.zeros((th, wpad), jnp.float32) for _ in range(tch)]
    for ci in range(cin):
        for kh in range(3):
            rows = x_vmem[ci, pl.ds(kh, th), :].astype(jnp.float32)
            for t in range(tch):
                v[t] = v[t] + wv_ref[(t * cin + ci) * 3 + kh] * rows

    # ---- Stage C: horizontal 3-tap ------------------------------------------
    # Left-shifts via pltpu.roll go to the XLU slot and co-issue with VPU FMAs;
    # the wrap garbage only lands in the 2 columns cropped by the wrapper.
    z = []
    for t in range(tch):
        zt = wh_ref[t * 3] * v[t]
        for kw in (1, 2):
            zt = zt + wh_ref[t * 3 + kw] * pltpu.roll(v[t], shift=wpad - kw,
                                                      axis=1)
        z.append(zt)

    # ---- Stage D: 1x1 (T->Cout) ---------------------------------------------
    # Exactly one full-width, lane-dense store per output channel per tile.
    for co in range(cout):
        acc = wp_ref[co * tch] * z[0]
        for t in range(1, tch):
            acc = acc + wp_ref[co * tch + t] * z[t]
        o_ref[0, co] = acc.astype(o_ref.dtype)


def ultra_conv_pallas(x_nchw, w_conv0, w_conv1, w_conv2, w_pw):
    """x_nchw: (N, Cin, H, W). Weights in PyTorch Conv2d layouts:
       w_conv0: (T, Cin, 1, 1), w_conv1: (T, 1, 3, 1),
       w_conv2: (T, 1, 1, 3),   w_pw:   (Cout, T, 1, 1)."""
    N, Cin, H, W = x_nchw.shape
    T = w_conv0.shape[0]
    Cout = w_pw.shape[0]
    assert H > 2 and W > 2, "ultra_conv with VALID (3,1)+(1,3) needs H,W > 2"
    Ho, Wo = H - 2, W - 2

    # Separable weights (kept separable -- NOT folded into a dense 3x3).
    w0 = w_conv0[:, :, 0, 0].astype(jnp.float32)       # (T, Cin)
    w1 = w_conv1[:, 0, :, 0].astype(jnp.float32)       # (T, 3)  vertical
    w2 = w_conv2[:, 0, 0, :].astype(jnp.float32)       # (T, 3)  horizontal
    wpw = w_pw[:, :, 0, 0].astype(jnp.float32)         # (Cout, T)
    wv = (w0[:, :, None] * w1[:, None, :]).reshape(-1)  # [t,ci,kh] flattened
    wh = w2.reshape(-1)                                  # [t,kw]
    wpf = wpw.reshape(-1)                                # [co,t]

    # Row tile: 8-16 rows keeps ~(T+2) full-width f32 row-tiles inside the
    # 64-vreg file (wide images drop to 8 rows) while giving the pipeline and
    # megacore enough steps.  Ho is padded to a multiple of TH (no tail tiles,
    # no masked stores); W is padded to a multiple of 128 (lane-dense stores,
    # uniform roll path).  Pad rows/columns produce garbage that is cropped.
    TH = 8 if (Ho <= 8 or W > 512) else 16
    nh = -(-Ho // TH)
    Ho_pad = nh * TH
    Wp = -(-W // 128) * 128
    Hp = Ho_pad + 2

    pad_h, pad_w = Hp - H, Wp - W
    xp = x_nchw
    if pad_h or pad_w:
        xp = jnp.pad(x_nchw, ((0, 0), (0, 0), (0, pad_h), (0, pad_w)))

    # Explicit scoped-VMEM budget from the chosen block sizes (with headroom).
    itemsize = jnp.dtype(x_nchw.dtype).itemsize
    vmem_bytes = (2 * Cin * (TH + 2) * Wp * itemsize      # input double buffer
                  + 2 * Cout * TH * Wp * itemsize)        # output double buffer
    vmem_limit = int(min(64 * 2**20, max(16 * 2**20, 4 * vmem_bytes)))

    kernel = functools.partial(_ultra_conv_kernel, cin=Cin, tch=T, cout=Cout,
                               th=TH, wpad=Wp)

    out_p = pl.pallas_call(
        kernel,
        out_shape=jax.ShapeDtypeStruct((N, Cout, Ho_pad, Wp), x_nchw.dtype),
        grid=(N, nh),
        in_specs=[
            # Input stays in HBM; (Cin, TH+2, Wp) halo slabs are DMAed manually.
            pl.BlockSpec(memory_space=pl.ANY),
            # Tiny separable weights live in SMEM for cheap scalar broadcasts.
            pl.BlockSpec(memory_space=pltpu.MemorySpace.SMEM),
            pl.BlockSpec(memory_space=pltpu.MemorySpace.SMEM),
            pl.BlockSpec(memory_space=pltpu.MemorySpace.SMEM),
        ],
        out_specs=pl.BlockSpec((1, Cout, TH, Wp), lambda n, h: (n, 0, h, 0)),
        scratch_shapes=[
            pltpu.VMEM((2, Cin, TH + 2, Wp), x_nchw.dtype),
            pltpu.SemaphoreType.DMA((2,)),
        ],
        compiler_params=pltpu.CompilerParams(
            # The h axis must stay "arbitrary": the input prefetch chain is
            # keyed on consecutive h steps.  Batch is "parallel" for megacore.
            dimension_semantics=("parallel", "arbitrary"),
            vmem_limit_bytes=vmem_limit),
    )(xp, wv, wh, wpf)

    # Crop the row padding and the 2 garbage (roll-wrap / pad) columns.
    return out_p[:, :, :Ho, :Wo]


def ultra_conv_reference(x_nchw, w_conv0, w_conv1, w_conv2, w_pw):
    """Pure-JAX reference using lax convs (mirrors the PyTorch forward)."""
    dn = ("NCHW", "OIHW", "NCHW")
    T = w_conv0.shape[0]
    y = lax.conv_general_dilated(x_nchw, w_conv0, (1, 1), "VALID",
                                 dimension_numbers=dn)
    y = lax.conv_general_dilated(y, w_conv1, (1, 1), "VALID",
                                 dimension_numbers=dn, feature_group_count=T)
    y = lax.conv_general_dilated(y, w_conv2, (1, 1), "VALID",
                                 dimension_numbers=dn, feature_group_count=T)
    y = lax.conv_general_dilated(y, w_pw, (1, 1), "VALID",
                                 dimension_numbers=dn)
    return y


if __name__ == "__main__":
    # Small shapes consistent with the module (NCHW input, like PyTorch).
    N, Cin, H, W = 2, 4, 16, 16
    Cout = 8
    delta = 1
    T = int(Cin * delta)

    key = jax.random.PRNGKey(0)
    kx, k0, k1, k2, k3 = jax.random.split(key, 5)

    x = jax.random.normal(kx, (N, Cin, H, W), dtype=jnp.float32)
    # Deterministic synthetic weights in PyTorch Conv2d layouts.
    w_conv0 = jax.random.normal(k0, (T, Cin, 1, 1), dtype=jnp.float32) * 0.1
    w_conv1 = jax.random.normal(k1, (T, 1, 3, 1), dtype=jnp.float32) * 0.1
    w_conv2 = jax.random.normal(k2, (T, 1, 1, 3), dtype=jnp.float32) * 0.1
    w_pw = jax.random.normal(k3, (Cout, T, 1, 1), dtype=jnp.float32) * 0.1

    out = ultra_conv_pallas(x, w_conv0, w_conv1, w_conv2, w_pw)
    out = jax.block_until_ready(out)

    ref = ultra_conv_reference(x, w_conv0, w_conv1, w_conv2, w_pw)
    ref = jax.block_until_ready(ref)

    assert out.shape == (N, Cout, H - 2, W - 2), out.shape
    assert jnp.allclose(out, ref, atol=1e-4, rtol=1e-4), float(
        jnp.max(jnp.abs(out - ref)))

    print("KERNEL_OK")
</pallas_src>

<mosaic_0001>
module attributes {stable_mosaic.version = 11 : i64} {
  func.func @_ultra_conv_kernel(%arg0: i32, %arg1: i32, %arg2: memref<2x4x18x128xf32, #tpu.memory_space<any>>, %arg3: memref<48xf32, #tpu.memory_space<smem>>, %arg4: memref<12xf32, #tpu.memory_space<smem>>, %arg5: memref<32xf32, #tpu.memory_space<smem>>, %arg6: memref<1x8x16x128xf32, #tpu.memory_space<vmem>>, %arg7: memref<2x4x18x128xf32, #tpu.memory_space<vmem>>, %arg8: memref<2x!tpu.dma_semaphore, #tpu.memory_space<semaphore_mem>>) attributes {dimension_semantics = [#tpu.dimension_semantics<parallel>, #tpu.dimension_semantics<arbitrary>], iteration_bounds = array<i64: 2, 1>, scalar_prefetch = 0 : i64, scratch_operands = 2 : i64, tpu.core_type = #tpu.core_type<tc>, window_params = [{}, {transform_indices = @transform_1, window_bounds = array<i64: 48>}, {transform_indices = @transform_2, window_bounds = array<i64: 12>}, {transform_indices = @transform_3, window_bounds = array<i64: 32>}, {transform_indices = @transform_4, window_bounds = array<i64: 1, 8, 16, 128>}]} {
    %c2_i32 = arith.constant 2 : i32
    %c0_i32 = arith.constant 0 : i32
    %0 = arith.cmpi eq, %c2_i32, %c0_i32 : i32
    %c1_i32 = arith.constant 1 : i32
    %1 = arith.select %0, %c1_i32, %c2_i32 : i32
    %2 = arith.remsi %arg1, %1 : i32
    %c0_i32_0 = arith.constant 0 : i32
    %3 = arith.cmpi ne, %2, %c0_i32_0 : i32
    %c0_i32_1 = arith.constant 0 : i32
    %4 = arith.cmpi slt, %2, %c0_i32_1 : i32
    %c0_i32_2 = arith.constant 0 : i32
    %5 = arith.cmpi slt, %1, %c0_i32_2 : i32
    %6 = arith.xori %4, %5 : i1
    %7 = arith.andi %6, %3 : i1
    %8 = arith.addi %2, %1 : i32
    %9 = arith.select %7, %8, %2 : i32
    %c0_i32_3 = arith.constant 0 : i32
    %10 = arith.cmpi eq, %arg1, %c0_i32_3 : i32
    %11 = arith.extui %10 : i1 to i32
    %c0_i32_4 = arith.constant 0 : i32
    %12 = arith.cmpi ne, %11, %c0_i32_4 : i32
    scf.if %12 {
      %c0_i32_170 = arith.constant 0 : i32
      %c0_i32_171 = arith.constant 0 : i32
      %c0_i32_172 = arith.constant 0 : i32
      %c0_i32_173 = arith.constant 0 : i32
      %c0_i32_174 = arith.constant 0 : i32
      %464 = tpu.memref_slice %arg2[%arg0, %c0_i32_172, %c0_i32_173, %c0_i32_174] : memref<2x4x18x128xf32, #tpu.memory_space<any>> -> memref<1x4x18x128xf32, #tpu.memory_space<any>>
      %465 = tpu.memref_squeeze %464 : memref<1x4x18x128xf32, #tpu.memory_space<any>> -> memref<4x18x128xf32, #tpu.memory_space<any>>
      %c0_i32_175 = arith.constant 0 : i32
      %c0_i32_176 = arith.constant 0 : i32
      %c0_i32_177 = arith.constant 0 : i32
      %466 = tpu.memref_slice %arg7[%c0_i32_170, %c0_i32_175, %c0_i32_176, %c0_i32_177] : memref<2x4x18x128xf32, #tpu.memory_space<vmem>> -> memref<1x4x18x128xf32, #tpu.memory_space<vmem>>
      %467 = tpu.memref_squeeze %466 : memref<1x4x18x128xf32, #tpu.memory_space<vmem>> -> memref<4x18x128xf32, #tpu.memory_space<vmem>>
      %468 = tpu.memref_slice %arg8[%c0_i32_171] : memref<2x!tpu.dma_semaphore, #tpu.memory_space<semaphore_mem>> -> memref<1x!tpu.dma_semaphore, #tpu.memory_space<semaphore_mem>>
      %469 = tpu.memref_squeeze %468 : memref<1x!tpu.dma_semaphore, #tpu.memory_space<semaphore_mem>> -> memref<!tpu.dma_semaphore, #tpu.memory_space<semaphore_mem>>
      tpu.enqueue_dma source(%465 : memref<4x18x128xf32, #tpu.memory_space<any>>) target(%467 : memref<4x18x128xf32, #tpu.memory_space<vmem>>) target_semaphore(%469 : memref<!tpu.dma_semaphore, #tpu.memory_space<semaphore_mem>>)
    } else {
    }
    %c1_i32_5 = arith.constant 1 : i32
    %13 = arith.addi %arg1, %c1_i32_5 : i32
    %c1_i32_6 = arith.constant 1 : i32
    %14 = arith.cmpi slt, %13, %c1_i32_6 : i32
    %15 = arith.extui %14 : i1 to i32
    %c0_i32_7 = arith.constant 0 : i32
    %16 = arith.cmpi ne, %15, %c0_i32_7 : i32
    scf.if %16 {
      %c1_i32_170 = arith.constant 1 : i32
      %464 = arith.addi %arg1, %c1_i32_170 : i32
      %c16_i32_171 = arith.constant 16 : i32
      %465 = arith.muli %464, %c16_i32_171 : i32
      %c1_i32_172 = arith.constant 1 : i32
      %466 = arith.subi %c1_i32_172, %9 : i32
      %c1_i32_173 = arith.constant 1 : i32
      %467 = arith.subi %c1_i32_173, %9 : i32
      %c0_i32_174 = arith.constant 0 : i32
      %c0_i32_175 = arith.constant 0 : i32
      %468 = tpu.memref_slice %arg2[%arg0, %c0_i32_174, %465, %c0_i32_175] : memref<2x4x18x128xf32, #tpu.memory_space<any>> -> memref<1x4x18x128xf32, #tpu.memory_space<any>>
      %469 = tpu.memref_squeeze %468 : memref<1x4x18x128xf32, #tpu.memory_space<any>> -> memref<4x18x128xf32, #tpu.memory_space<any>>
      %c0_i32_176 = arith.constant 0 : i32
      %c0_i32_177 = arith.constant 0 : i32
      %c0_i32_178 = arith.constant 0 : i32
      %470 = tpu.memref_slice %arg7[%466, %c0_i32_176, %c0_i32_177, %c0_i32_178] : memref<2x4x18x128xf32, #tpu.memory_space<vmem>> -> memref<1x4x18x128xf32, #tpu.memory_space<vmem>>
      %471 = tpu.memref_squeeze %470 : memref<1x4x18x128xf32, #tpu.memory_space<vmem>> -> memref<4x18x128xf32, #tpu.memory_space<vmem>>
      %472 = tpu.memref_slice %arg8[%467] : memref<2x!tpu.dma_semaphore, #tpu.memory_space<semaphore_mem>> -> memref<1x!tpu.dma_semaphore, #tpu.memory_space<semaphore_mem>>
      %473 = tpu.memref_squeeze %472 : memref<1x!tpu.dma_semaphore, #tpu.memory_space<semaphore_mem>> -> memref<!tpu.dma_semaphore, #tpu.memory_space<semaphore_mem>>
      tpu.enqueue_dma source(%469 : memref<4x18x128xf32, #tpu.memory_space<any>>) target(%471 : memref<4x18x128xf32, #tpu.memory_space<vmem>>) target_semaphore(%473 : memref<!tpu.dma_semaphore, #tpu.memory_space<semaphore_mem>>)
    } else {
    }
    %c16_i32 = arith.constant 16 : i32
    %17 = arith.muli %arg1, %c16_i32 : i32
    %c0_i32_8 = arith.constant 0 : i32
    %c0_i32_9 = arith.constant 0 : i32
    %18 = tpu.memref_slice %arg2[%arg0, %c0_i32_8, %17, %c0_i32_9] : memref<2x4x18x128xf32, #tpu.memory_space<any>> -> memref<1x4x18x128xf32, #tpu.memory_space<any>>
    %19 = tpu.memref_squeeze %18 : memref<1x4x18x128xf32, #tpu.memory_space<any>> -> memref<4x18x128xf32, #tpu.memory_space<any>>
    %c0_i32_10 = arith.constant 0 : i32
    %c0_i32_11 = arith.constant 0 : i32
    %c0_i32_12 = arith.constant 0 : i32
    %20 = tpu.memref_slice %arg7[%9, %c0_i32_10, %c0_i32_11, %c0_i32_12] : memref<2x4x18x128xf32, #tpu.memory_space<vmem>> -> memref<1x4x18x128xf32, #tpu.memory_space<vmem>>
    %21 = tpu.memref_squeeze %20 : memref<1x4x18x128xf32, #tpu.memory_space<vmem>> -> memref<4x18x128xf32, #tpu.memory_space<vmem>>
    %22 = tpu.memref_slice %arg8[%9] : memref<2x!tpu.dma_semaphore, #tpu.memory_space<semaphore_mem>> -> memref<1x!tpu.dma_semaphore, #tpu.memory_space<semaphore_mem>>
    %23 = tpu.memref_squeeze %22 : memref<1x!tpu.dma_semaphore, #tpu.memory_space<semaphore_mem>> -> memref<!tpu.dma_semaphore, #tpu.memory_space<semaphore_mem>>
    tpu.wait_dma2 semaphore(%23 : memref<!tpu.dma_semaphore, #tpu.memory_space<semaphore_mem>>) src(%19 : memref<4x18x128xf32, #tpu.memory_space<any>>) dst(%21 : memref<4x18x128xf32, #tpu.memory_space<vmem>>)
    %cst = arith.constant 0.000000e+00 : f32
    %24 = vector.broadcast %cst : f32 to vector<16x128xf32>
    %cst_13 = arith.constant 0.000000e+00 : f32
    %25 = vector.broadcast %cst_13 : f32 to vector<16x128xf32>
    %cst_14 = arith.constant 0.000000e+00 : f32
    %26 = vector.broadcast %cst_14 : f32 to vector<16x128xf32>
    %cst_15 = arith.constant 0.000000e+00 : f32
    %27 = vector.broadcast %cst_15 : f32 to vector<16x128xf32>
    %c0_i32_16 = arith.constant 0 : i32
    %c0_i32_17 = arith.constant 0 : i32
    %c0_i32_18 = arith.constant 0 : i32
    %28 = tpu.memref_slice %arg7[%9, %c0_i32_16, %c0_i32_17, %c0_i32_18] : memref<2x4x18x128xf32, #tpu.memory_space<vmem>> -> memref<1x4x18x128xf32, #tpu.memory_space<vmem>>
    %29 = tpu.memref_squeeze %28 : memref<1x4x18x128xf32, #tpu.memory_space<vmem>> -> memref<4x18x128xf32, #tpu.memory_space<vmem>>
    %c0 = arith.constant 0 : index
    %c0_19 = arith.constant 0 : index
    %c0_20 = arith.constant 0 : index
    %30 = vector.load %29[%c0, %c0_19, %c0_20] : memref<4x18x128xf32, #tpu.memory_space<vmem>>, vector<1x16x128xf32>
    %31 = vector.shape_cast %30 : vector<1x16x128xf32> to vector<16x128xf32>
    %c0_21 = arith.constant 0 : index
    %32 = memref.load %arg3[%c0_21] : memref<48xf32, #tpu.memory_space<smem>>
    %33 = vector.broadcast %32 : f32 to vector<16x128xf32>
    %34 = arith.mulf %33, %31 : vector<16x128xf32>
    %35 = arith.addf %24, %34 : vector<16x128xf32>
    %c12 = arith.constant 12 : index
    %36 = memref.load %arg3[%c12] : memref<48xf32, #tpu.memory_space<smem>>
    %37 = vector.broadcast %36 : f32 to vector<16x128xf32>
    %38 = arith.mulf %37, %31 : vector<16x128xf32>
    %39 = arith.addf %25, %38 : vector<16x128xf32>
    %c24 = arith.constant 24 : index
    %40 = memref.load %arg3[%c24] : memref<48xf32, #tpu.memory_space<smem>>
    %41 = vector.broadcast %40 : f32 to vector<16x128xf32>
    %42 = arith.mulf %41, %31 : vector<16x128xf32>
    %43 = arith.addf %26, %42 : vector<16x128xf32>
    %c36 = arith.constant 36 : index
    %44 = memref.load %arg3[%c36] : memref<48xf32, #tpu.memory_space<smem>>
    %45 = vector.broadcast %44 : f32 to vector<16x128xf32>
    %46 = arith.mulf %45, %31 : vector<16x128xf32>
    %47 = arith.addf %27, %46 : vector<16x128xf32>
    %c0_i32_22 = arith.constant 0 : i32
    %c0_i32_23 = arith.constant 0 : i32
    %c0_i32_24 = arith.constant 0 : i32
    %48 = tpu.memref_slice %arg7[%9, %c0_i32_22, %c0_i32_23, %c0_i32_24] : memref<2x4x18x128xf32, #tpu.memory_space<vmem>> -> memref<1x4x18x128xf32, #tpu.memory_space<vmem>>
    %49 = tpu.memref_squeeze %48 : memref<1x4x18x128xf32, #tpu.memory_space<vmem>> -> memref<4x18x128xf32, #tpu.memory_space<vmem>>
    %c0_25 = arith.constant 0 : index
    %c1 = arith.constant 1 : index
    %c0_26 = arith.constant 0 : index
    %50 = vector.load %49[%c0_25, %c1, %c0_26] : memref<4x18x128xf32, #tpu.memory_space<vmem>>, vector<1x16x128xf32>
    %51 = vector.shape_cast %50 : vector<1x16x128xf32> to vector<16x128xf32>
    %c1_27 = arith.constant 1 : index
    %52 = memref.load %arg3[%c1_27] : memref<48xf32, #tpu.memory_space<smem>>
    %53 = vector.broadcast %52 : f32 to vector<16x128xf32>
    %54 = arith.mulf %53, %51 : vector<16x128xf32>
    %55 = arith.addf %35, %54 : vector<16x128xf32>
    %c13 = arith.constant 13 : index
    %56 = memref.load %arg3[%c13] : memref<48xf32, #tpu.memory_space<smem>>
    %57 = vector.broadcast %56 : f32 to vector<16x128xf32>
    %58 = arith.mulf %57, %51 : vector<16x128xf32>
    %59 = arith.addf %39, %58 : vector<16x128xf32>
    %c25 = arith.constant 25 : index
    %60 = memref.load %arg3[%c25] : memref<48xf32, #tpu.memory_space<smem>>
    %61 = vector.broadcast %60 : f32 to vector<16x128xf32>
    %62 = arith.mulf %61, %51 : vector<16x128xf32>
    %63 = arith.addf %43, %62 : vector<16x128xf32>
    %c37 = arith.constant 37 : index
    %64 = memref.load %arg3[%c37] : memref<48xf32, #tpu.memory_space<smem>>
    %65 = vector.broadcast %64 : f32 to vector<16x128xf32>
    %66 = arith.mulf %65, %51 : vector<16x128xf32>
    %67 = arith.addf %47, %66 : vector<16x128xf32>
    %c0_i32_28 = arith.constant 0 : i32
    %c0_i32_29 = arith.constant 0 : i32
    %c0_i32_30 = arith.constant 0 : i32
    %68 = tpu.memref_slice %arg7[%9, %c0_i32_28, %c0_i32_29, %c0_i32_30] : memref<2x4x18x128xf32, #tpu.memory_space<vmem>> -> memref<1x4x18x128xf32, #tpu.memory_space<vmem>>
    %69 = tpu.memref_squeeze %68 : memref<1x4x18x128xf32, #tpu.memory_space<vmem>> -> memref<4x18x128xf32, #tpu.memory_space<vmem>>
    %c0_31 = arith.constant 0 : index
    %c2 = arith.constant 2 : index
    %c0_32 = arith.constant 0 : index
    %70 = vector.load %69[%c0_31, %c2, %c0_32] : memref<4x18x128xf32, #tpu.memory_space<vmem>>, vector<1x16x128xf32>
    %71 = vector.shape_cast %70 : vector<1x16x128xf32> to vector<16x128xf32>
    %c2_33 = arith.constant 2 : index
    %72 = memref.load %arg3[%c2_33] : memref<48xf32, #tpu.memory_space<smem>>
    %73 = vector.broadcast %72 : f32 to vector<16x128xf32>
    %74 = arith.mulf %73, %71 : vector<16x128xf32>
    %75 = arith.addf %55, %74 : vector<16x128xf32>
    %c14 = arith.constant 14 : index
    %76 = memref.load %arg3[%c14] : memref<48xf32, #tpu.memory_space<smem>>
    %77 = vector.broadcast %76 : f32 to vector<16x128xf32>
    %78 = arith.mulf %77, %71 : vector<16x128xf32>
    %79 = arith.addf %59, %78 : vector<16x128xf32>
    %c26 = arith.constant 26 : index
    %80 = memref.load %arg3[%c26] : memref<48xf32, #tpu.memory_space<smem>>
    %81 = vector.broadcast %80 : f32 to vector<16x128xf32>
    %82 = arith.mulf %81, %71 : vector<16x128xf32>
    %83 = arith.addf %63, %82 : vector<16x128xf32>
    %c38 = arith.constant 38 : index
    %84 = memref.load %arg3[%c38] : memref<48xf32, #tpu.memory_space<smem>>
    %85 = vector.broadcast %84 : f32 to vector<16x128xf32>
    %86 = arith.mulf %85, %71 : vector<16x128xf32>
    %87 = arith.addf %67, %86 : vector<16x128xf32>
    %c0_i32_34 = arith.constant 0 : i32
    %c0_i32_35 = arith.constant 0 : i32
    %c0_i32_36 = arith.constant 0 : i32
    %88 = tpu.memref_slice %arg7[%9, %c0_i32_34, %c0_i32_35, %c0_i32_36] : memref<2x4x18x128xf32, #tpu.memory_space<vmem>> -> memref<1x4x18x128xf32, #tpu.memory_space<vmem>>
    %89 = tpu.memref_squeeze %88 : memref<1x4x18x128xf32, #tpu.memory_space<vmem>> -> memref<4x18x128xf32, #tpu.memory_space<vmem>>
    %c1_37 = arith.constant 1 : index
    %c0_38 = arith.constant 0 : index
    %c0_39 = arith.constant 0 : index
    %90 = vector.load %89[%c1_37, %c0_38, %c0_39] : memref<4x18x128xf32, #tpu.memory_space<vmem>>, vector<1x16x128xf32>
    %91 = vector.shape_cast %90 : vector<1x16x128xf32> to vector<16x128xf32>
    %c3 = arith.constant 3 : index
    %92 = memref.load %arg3[%c3] : memref<48xf32, #tpu.memory_space<smem>>
    %93 = vector.broadcast %92 : f32 to vector<16x128xf32>
    %94 = arith.mulf %93, %91 : vector<16x128xf32>
    %95 = arith.addf %75, %94 : vector<16x128xf32>
    %c15 = arith.constant 15 : index
    %96 = memref.load %arg3[%c15] : memref<48xf32, #tpu.memory_space<smem>>
    %97 = vector.broadcast %96 : f32 to vector<16x128xf32>
    %98 = arith.mulf %97, %91 : vector<16x128xf32>
    %99 = arith.addf %79, %98 : vector<16x128xf32>
    %c27 = arith.constant 27 : index
    %100 = memref.load %arg3[%c27] : memref<48xf32, #tpu.memory_space<smem>>
    %101 = vector.broadcast %100 : f32 to vector<16x128xf32>
    %102 = arith.mulf %101, %91 : vector<16x128xf32>
    %103 = arith.addf %83, %102 : vector<16x128xf32>
    %c39 = arith.constant 39 : index
    %104 = memref.load %arg3[%c39] : memref<48xf32, #tpu.memory_space<smem>>
    %105 = vector.broadcast %104 : f32 to vector<16x128xf32>
    %106 = arith.mulf %105, %91 : vector<16x128xf32>
    %107 = arith.addf %87, %106 : vector<16x128xf32>
    %c0_i32_40 = arith.constant 0 : i32
    %c0_i32_41 = arith.constant 0 : i32
    %c0_i32_42 = arith.constant 0 : i32
    %108 = tpu.memref_slice %arg7[%9, %c0_i32_40, %c0_i32_41, %c0_i32_42] : memref<2x4x18x128xf32, #tpu.memory_space<vmem>> -> memref<1x4x18x128xf32, #tpu.memory_space<vmem>>
    %109 = tpu.memref_squeeze %108 : memref<1x4x18x128xf32, #tpu.memory_space<vmem>> -> memref<4x18x128xf32, #tpu.memory_space<vmem>>
    %c1_43 = arith.constant 1 : index
    %c1_44 = arith.constant 1 : index
    %c0_45 = arith.constant 0 : index
    %110 = vector.load %109[%c1_43, %c1_44, %c0_45] : memref<4x18x128xf32, #tpu.memory_space<vmem>>, vector<1x16x128xf32>
    %111 = vector.shape_cast %110 : vector<1x16x128xf32> to vector<16x128xf32>
    %c4 = arith.constant 4 : index
    %112 = memref.load %arg3[%c4] : memref<48xf32, #tpu.memory_space<smem>>
    %113 = vector.broadcast %112 : f32 to vector<16x128xf32>
    %114 = arith.mulf %113, %111 : vector<16x128xf32>
    %115 = arith.addf %95, %114 : vector<16x128xf32>
    %c16 = arith.constant 16 : index
    %116 = memref.load %arg3[%c16] : memref<48xf32, #tpu.memory_space<smem>>
    %117 = vector.broadcast %116 : f32 to vector<16x128xf32>
    %118 = arith.mulf %117, %111 : vector<16x128xf32>
    %119 = arith.addf %99, %118 : vector<16x128xf32>
    %c28 = arith.constant 28 : index
    %120 = memref.load %arg3[%c28] : memref<48xf32, #tpu.memory_space<smem>>
    %121 = vector.broadcast %120 : f32 to vector<16x128xf32>
    %122 = arith.mulf %121, %111 : vector<16x128xf32>
    %123 = arith.addf %103, %122 : vector<16x128xf32>
    %c40 = arith.constant 40 : index
    %124 = memref.load %arg3[%c40] : memref<48xf32, #tpu.memory_space<smem>>
    %125 = vector.broadcast %124 : f32 to vector<16x128xf32>
    %126 = arith.mulf %125, %111 : vector<16x128xf32>
    %127 = arith.addf %107, %126 : vector<16x128xf32>
    %c0_i32_46 = arith.constant 0 : i32
    %c0_i32_47 = arith.constant 0 : i32
    %c0_i32_48 = arith.constant 0 : i32
    %128 = tpu.memref_slice %arg7[%9, %c0_i32_46, %c0_i32_47, %c0_i32_48] : memref<2x4x18x128xf32, #tpu.memory_space<vmem>> -> memref<1x4x18x128xf32, #tpu.memory_space<vmem>>
    %129 = tpu.memref_squeeze %128 : memref<1x4x18x128xf32, #tpu.memory_space<vmem>> -> memref<4x18x128xf32, #tpu.memory_space<vmem>>
    %c1_49 = arith.constant 1 : index
    %c2_50 = arith.constant 2 : index
    %c0_51 = arith.constant 0 : index
    %130 = vector.load %129[%c1_49, %c2_50, %c0_51] : memref<4x18x128xf32, #tpu.memory_space<vmem>>, vector<1x16x128xf32>
    %131 = vector.shape_cast %130 : vector<1x16x128xf32> to vector<16x128xf32>
    %c5 = arith.constant 5 : index
    %132 = memref.load %arg3[%c5] : memref<48xf32, #tpu.memory_space<smem>>
    %133 = vector.broadcast %132 : f32 to vector<16x128xf32>
    %134 = arith.mulf %133, %131 : vector<16x128xf32>
    %135 = arith.addf %115, %134 : vector<16x128xf32>
    %c17 = arith.constant 17 : index
    %136 = memref.load %arg3[%c17] : memref<48xf32, #tpu.memory_space<smem>>
    %137 = vector.broadcast %136 : f32 to vector<16x128xf32>
    %138 = arith.mulf %137, %131 : vector<16x128xf32>
    %139 = arith.addf %119, %138 : vector<16x128xf32>
    %c29 = arith.constant 29 : index
    %140 = memref.load %arg3[%c29] : memref<48xf32, #tpu.memory_space<smem>>
    %141 = vector.broadcast %140 : f32 to vector<16x128xf32>
    %142 = arith.mulf %141, %131 : vector<16x128xf32>
    %143 = arith.addf %123, %142 : vector<16x128xf32>
    %c41 = arith.constant 41 : index
    %144 = memref.load %arg3[%c41] : memref<48xf32, #tpu.memory_space<smem>>
    %145 = vector.broadcast %144 : f32 to vector<16x128xf32>
    %146 = arith.mulf %145, %131 : vector<16x128xf32>
    %147 = arith.addf %127, %146 : vector<16x128xf32>
    %c0_i32_52 = arith.constant 0 : i32
    %c0_i32_53 = arith.constant 0 : i32
    %c0_i32_54 = arith.constant 0 : i32
    %148 = tpu.memref_slice %arg7[%9, %c0_i32_52, %c0_i32_53, %c0_i32_54] : memref<2x4x18x128xf32, #tpu.memory_space<vmem>> -> memref<1x4x18x128xf32, #tpu.memory_space<vmem>>
    %149 = tpu.memref_squeeze %148 : memref<1x4x18x128xf32, #tpu.memory_space<vmem>> -> memref<4x18x128xf32, #tpu.memory_space<vmem>>
    %c2_55 = arith.constant 2 : index
    %c0_56 = arith.constant 0 : index
    %c0_57 = arith.constant 0 : index
    %150 = vector.load %149[%c2_55, %c0_56, %c0_57] : memref<4x18x128xf32, #tpu.memory_space<vmem>>, vector<1x16x128xf32>
    %151 = vector.shape_cast %150 : vector<1x16x128xf32> to vector<16x128xf32>
    %c6 = arith.constant 6 : index
    %152 = memref.load %arg3[%c6] : memref<48xf32, #tpu.memory_space<smem>>
    %153 = vector.broadcast %152 : f32 to vector<16x128xf32>
    %154 = arith.mulf %153, %151 : vector<16x128xf32>
    %155 = arith.addf %135, %154 : vector<16x128xf32>
    %c18 = arith.constant 18 : index
    %156 = memref.load %arg3[%c18] : memref<48xf32, #tpu.memory_space<smem>>
    %157 = vector.broadcast %156 : f32 to vector<16x128xf32>
    %158 = arith.mulf %157, %151 : vector<16x128xf32>
    %159 = arith.addf %139, %158 : vector<16x128xf32>
    %c30 = arith.constant 30 : index
    %160 = memref.load %arg3[%c30] : memref<48xf32, #tpu.memory_space<smem>>
    %161 = vector.broadcast %160 : f32 to vector<16x128xf32>
    %162 = arith.mulf %161, %151 : vector<16x128xf32>
    %163 = arith.addf %143, %162 : vector<16x128xf32>
    %c42 = arith.constant 42 : index
    %164 = memref.load %arg3[%c42] : memref<48xf32, #tpu.memory_space<smem>>
    %165 = vector.broadcast %164 : f32 to vector<16x128xf32>
    %166 = arith.mulf %165, %151 : vector<16x128xf32>
    %167 = arith.addf %147, %166 : vector<16x128xf32>
    %c0_i32_58 = arith.constant 0 : i32
    %c0_i32_59 = arith.constant 0 : i32
    %c0_i32_60 = arith.constant 0 : i32
    %168 = tpu.memref_slice %arg7[%9, %c0_i32_58, %c0_i32_59, %c0_i32_60] : memref<2x4x18x128xf32, #tpu.memory_space<vmem>> -> memref<1x4x18x128xf32, #tpu.memory_space<vmem>>
    %169 = tpu.memref_squeeze %168 : memref<1x4x18x128xf32, #tpu.memory_space<vmem>> -> memref<4x18x128xf32, #tpu.memory_space<vmem>>
    %c2_61 = arith.constant 2 : index
    %c1_62 = arith.constant 1 : index
    %c0_63 = arith.constant 0 : index
    %170 = vector.load %169[%c2_61, %c1_62, %c0_63] : memref<4x18x128xf32, #tpu.memory_space<vmem>>, vector<1x16x128xf32>
    %171 = vector.shape_cast %170 : vector<1x16x128xf32> to vector<16x128xf32>
    %c7 = arith.constant 7 : index
    %172 = memref.load %arg3[%c7] : memref<48xf32, #tpu.memory_space<smem>>
    %173 = vector.broadcast %172 : f32 to vector<16x128xf32>
    %174 = arith.mulf %173, %171 : vector<16x128xf32>
    %175 = arith.addf %155, %174 : vector<16x128xf32>
    %c19 = arith.constant 19 : index
    %176 = memref.load %arg3[%c19] : memref<48xf32, #tpu.memory_space<smem>>
    %177 = vector.broadcast %176 : f32 to vector<16x128xf32>
    %178 = arith.mulf %177, %171 : vector<16x128xf32>
    %179 = arith.addf %159, %178 : vector<16x128xf32>
    %c31 = arith.constant 31 : index
    %180 = memref.load %arg3[%c31] : memref<48xf32, #tpu.memory_space<smem>>
    %181 = vector.broadcast %180 : f32 to vector<16x128xf32>
    %182 = arith.mulf %181, %171 : vector<16x128xf32>
    %183 = arith.addf %163, %182 : vector<16x128xf32>
    %c43 = arith.constant 43 : index
    %184 = memref.load %arg3[%c43] : memref<48xf32, #tpu.memory_space<smem>>
    %185 = vector.broadcast %184 : f32 to vector<16x128xf32>
    %186 = arith.mulf %185, %171 : vector<16x128xf32>
    %187 = arith.addf %167, %186 : vector<16x128xf32>
    %c0_i32_64 = arith.constant 0 : i32
    %c0_i32_65 = arith.constant 0 : i32
    %c0_i32_66 = arith.constant 0 : i32
    %188 = tpu.memref_slice %arg7[%9, %c0_i32_64, %c0_i32_65, %c0_i32_66] : memref<2x4x18x128xf32, #tpu.memory_space<vmem>> -> memref<1x4x18x128xf32, #tpu.memory_space<vmem>>
    %189 = tpu.memref_squeeze %188 : memref<1x4x18x128xf32, #tpu.memory_space<vmem>> -> memref<4x18x128xf32, #tpu.memory_space<vmem>>
    %c2_67 = arith.constant 2 : index
    %c2_68 = arith.constant 2 : index
    %c0_69 = arith.constant 0 : index
    %190 = vector.load %189[%c2_67, %c2_68, %c0_69] : memref<4x18x128xf32, #tpu.memory_space<vmem>>, vector<1x16x128xf32>
    %191 = vector.shape_cast %190 : vector<1x16x128xf32> to vector<16x128xf32>
    %c8 = arith.constant 8 : index
    %192 = memref.load %arg3[%c8] : memref<48xf32, #tpu.memory_space<smem>>
    %193 = vector.broadcast %192 : f32 to vector<16x128xf32>
    %194 = arith.mulf %193, %191 : vector<16x128xf32>
    %195 = arith.addf %175, %194 : vector<16x128xf32>
    %c20 = arith.constant 20 : index
    %196 = memref.load %arg3[%c20] : memref<48xf32, #tpu.memory_space<smem>>
    %197 = vector.broadcast %196 : f32 to vector<16x128xf32>
    %198 = arith.mulf %197, %191 : vector<16x128xf32>
    %199 = arith.addf %179, %198 : vector<16x128xf32>
    %c32 = arith.constant 32 : index
    %200 = memref.load %arg3[%c32] : memref<48xf32, #tpu.memory_space<smem>>
    %201 = vector.broadcast %200 : f32 to vector<16x128xf32>
    %202 = arith.mulf %201, %191 : vector<16x128xf32>
    %203 = arith.addf %183, %202 : vector<16x128xf32>
    %c44 = arith.constant 44 : index
    %204 = memref.load %arg3[%c44] : memref<48xf32, #tpu.memory_space<smem>>
    %205 = vector.broadcast %204 : f32 to vector<16x128xf32>
    %206 = arith.mulf %205, %191 : vector<16x128xf32>
    %207 = arith.addf %187, %206 : vector<16x128xf32>
    %c0_i32_70 = arith.constant 0 : i32
    %c0_i32_71 = arith.constant 0 : i32
    %c0_i32_72 = arith.constant 0 : i32
    %208 = tpu.memref_slice %arg7[%9, %c0_i32_70, %c0_i32_71, %c0_i32_72] : memref<2x4x18x128xf32, #tpu.memory_space<vmem>> -> memref<1x4x18x128xf32, #tpu.memory_space<vmem>>
    %209 = tpu.memref_squeeze %208 : memref<1x4x18x128xf32, #tpu.memory_space<vmem>> -> memref<4x18x128xf32, #tpu.memory_space<vmem>>
    %c3_73 = arith.constant 3 : index
    %c0_74 = arith.constant 0 : index
    %c0_75 = arith.constant 0 : index
    %210 = vector.load %209[%c3_73, %c0_74, %c0_75] : memref<4x18x128xf32, #tpu.memory_space<vmem>>, vector<1x16x128xf32>
    %211 = vector.shape_cast %210 : vector<1x16x128xf32> to vector<16x128xf32>
    %c9 = arith.constant 9 : index
    %212 = memref.load %arg3[%c9] : memref<48xf32, #tpu.memory_space<smem>>
    %213 = vector.broadcast %212 : f32 to vector<16x128xf32>
    %214 = arith.mulf %213, %211 : vector<16x128xf32>
    %215 = arith.addf %195, %214 : vector<16x128xf32>
    %c21 = arith.constant 21 : index
    %216 = memref.load %arg3[%c21] : memref<48xf32, #tpu.memory_space<smem>>
    %217 = vector.broadcast %216 : f32 to vector<16x128xf32>
    %218 = arith.mulf %217, %211 : vector<16x128xf32>
    %219 = arith.addf %199, %218 : vector<16x128xf32>
    %c33 = arith.constant 33 : index
    %220 = memref.load %arg3[%c33] : memref<48xf32, #tpu.memory_space<smem>>
    %221 = vector.broadcast %220 : f32 to vector<16x128xf32>
    %222 = arith.mulf %221, %211 : vector<16x128xf32>
    %223 = arith.addf %203, %222 : vector<16x128xf32>
    %c45 = arith.constant 45 : index
    %224 = memref.load %arg3[%c45] : memref<48xf32, #tpu.memory_space<smem>>
    %225 = vector.broadcast %224 : f32 to vector<16x128xf32>
    %226 = arith.mulf %225, %211 : vector<16x128xf32>
    %227 = arith.addf %207, %226 : vector<16x128xf32>
    %c0_i32_76 = arith.constant 0 : i32
    %c0_i32_77 = arith.constant 0 : i32
    %c0_i32_78 = arith.constant 0 : i32
    %228 = tpu.memref_slice %arg7[%9, %c0_i32_76, %c0_i32_77, %c0_i32_78] : memref<2x4x18x128xf32, #tpu.memory_space<vmem>> -> memref<1x4x18x128xf32, #tpu.memory_space<vmem>>
    %229 = tpu.memref_squeeze %228 : memref<1x4x18x128xf32, #tpu.memory_space<vmem>> -> memref<4x18x128xf32, #tpu.memory_space<vmem>>
    %c3_79 = arith.constant 3 : index
    %c1_80 = arith.constant 1 : index
    %c0_81 = arith.constant 0 : index
    %230 = vector.load %229[%c3_79, %c1_80, %c0_81] : memref<4x18x128xf32, #tpu.memory_space<vmem>>, vector<1x16x128xf32>
    %231 = vector.shape_cast %230 : vector<1x16x128xf32> to vector<16x128xf32>
    %c10 = arith.constant 10 : index
    %232 = memref.load %arg3[%c10] : memref<48xf32, #tpu.memory_space<smem>>
    %233 = vector.broadcast %232 : f32 to vector<16x128xf32>
    %234 = arith.mulf %233, %231 : vector<16x128xf32>
    %235 = arith.addf %215, %234 : vector<16x128xf32>
    %c22 = arith.constant 22 : index
    %236 = memref.load %arg3[%c22] : memref<48xf32, #tpu.memory_space<smem>>
    %237 = vector.broadcast %236 : f32 to vector<16x128xf32>
    %238 = arith.mulf %237, %231 : vector<16x128xf32>
    %239 = arith.addf %219, %238 : vector<16x128xf32>
    %c34 = arith.constant 34 : index
    %240 = memref.load %arg3[%c34] : memref<48xf32, #tpu.memory_space<smem>>
    %241 = vector.broadcast %240 : f32 to vector<16x128xf32>
    %242 = arith.mulf %241, %231 : vector<16x128xf32>
    %243 = arith.addf %223, %242 : vector<16x128xf32>
    %c46 = arith.constant 46 : index
    %244 = memref.load %arg3[%c46] : memref<48xf32, #tpu.memory_space<smem>>
    %245 = vector.broadcast %244 : f32 to vector<16x128xf32>
    %246 = arith.mulf %245, %231 : vector<16x128xf32>
    %247 = arith.addf %227, %246 : vector<16x128xf32>
    %c0_i32_82 = arith.constant 0 : i32
    %c0_i32_83 = arith.constant 0 : i32
    %c0_i32_84 = arith.constant 0 : i32
    %248 = tpu.memref_slice %arg7[%9, %c0_i32_82, %c0_i32_83, %c0_i32_84] : memref<2x4x18x128xf32, #tpu.memory_space<vmem>> -> memref<1x4x18x128xf32, #tpu.memory_space<vmem>>
    %249 = tpu.memref_squeeze %248 : memref<1x4x18x128xf32, #tpu.memory_space<vmem>> -> memref<4x18x128xf32, #tpu.memory_space<vmem>>
    %c3_85 = arith.constant 3 : index
    %c2_86 = arith.constant 2 : index
    %c0_87 = arith.constant 0 : index
    %250 = vector.load %249[%c3_85, %c2_86, %c0_87] : memref<4x18x128xf32, #tpu.memory_space<vmem>>, vector<1x16x128xf32>
    %251 = vector.shape_cast %250 : vector<1x16x128xf32> to vector<16x128xf32>
    %c11 = arith.constant 11 : index
    %252 = memref.load %arg3[%c11] : memref<48xf32, #tpu.memory_space<smem>>
    %253 = vector.broadcast %252 : f32 to vector<16x128xf32>
    %254 = arith.mulf %253, %251 : vector<16x128xf32>
    %255 = arith.addf %235, %254 : vector<16x128xf32>
    %c23 = arith.constant 23 : index
    %256 = memref.load %arg3[%c23] : memref<48xf32, #tpu.memory_space<smem>>
    %257 = vector.broadcast %256 : f32 to vector<16x128xf32>
    %258 = arith.mulf %257, %251 : vector<16x128xf32>
    %259 = arith.addf %239, %258 : vector<16x128xf32>
    %c35 = arith.constant 35 : index
    %260 = memref.load %arg3[%c35] : memref<48xf32, #tpu.memory_space<smem>>
    %261 = vector.broadcast %260 : f32 to vector<16x128xf32>
    %262 = arith.mulf %261, %251 : vector<16x128xf32>
    %263 = arith.addf %243, %262 : vector<16x128xf32>
    %c47 = arith.constant 47 : index
    %264 = memref.load %arg3[%c47] : memref<48xf32, #tpu.memory_space<smem>>
    %265 = vector.broadcast %264 : f32 to vector<16x128xf32>
    %266 = arith.mulf %265, %251 : vector<16x128xf32>
    %267 = arith.addf %247, %266 : vector<16x128xf32>
    %c0_88 = arith.constant 0 : index
    %268 = memref.load %arg4[%c0_88] : memref<12xf32, #tpu.memory_space<smem>>
    %269 = vector.broadcast %268 : f32 to vector<16x128xf32>
    %270 = arith.mulf %269, %255 : vector<16x128xf32>
    %c1_89 = arith.constant 1 : index
    %271 = memref.load %arg4[%c1_89] : memref<12xf32, #tpu.memory_space<smem>>
    %c127_i32 = arith.constant 127 : i32
    %272 = tpu.dynamic_rotate %255 by %c127_i32 dim 1 : vector<16x128xf32>, i32 -> vector<16x128xf32>
    %273 = vector.broadcast %271 : f32 to vector<16x128xf32>
    %274 = arith.mulf %273, %272 : vector<16x128xf32>
    %275 = arith.addf %270, %274 : vector<16x128xf32>
    %c2_90 = arith.constant 2 : index
    %276 = memref.load %arg4[%c2_90] : memref<12xf32, #tpu.memory_space<smem>>
    %c126_i32 = arith.constant 126 : i32
    %277 = tpu.dynamic_rotate %255 by %c126_i32 dim 1 : vector<16x128xf32>, i32 -> vector<16x128xf32>
    %278 = vector.broadcast %276 : f32 to vector<16x128xf32>
    %279 = arith.mulf %278, %277 : vector<16x128xf32>
    %280 = arith.addf %275, %279 : vector<16x128xf32>
    %c3_91 = arith.constant 3 : index
    %281 = memref.load %arg4[%c3_91] : memref<12xf32, #tpu.memory_space<smem>>
    %282 = vector.broadcast %281 : f32 to vector<16x128xf32>
    %283 = arith.mulf %282, %259 : vector<16x128xf32>
    %c4_92 = arith.constant 4 : index
    %284 = memref.load %arg4[%c4_92] : memref<12xf32, #tpu.memory_space<smem>>
    %c127_i32_93 = arith.constant 127 : i32
    %285 = tpu.dynamic_rotate %259 by %c127_i32_93 dim 1 : vector<16x128xf32>, i32 -> vector<16x128xf32>
    %286 = vector.broadcast %284 : f32 to vector<16x128xf32>
    %287 = arith.mulf %286, %285 : vector<16x128xf32>
    %288 = arith.addf %283, %287 : vector<16x128xf32>
    %c5_94 = arith.constant 5 : index
    %289 = memref.load %arg4[%c5_94] : memref<12xf32, #tpu.memory_space<smem>>
    %c126_i32_95 = arith.constant 126 : i32
    %290 = tpu.dynamic_rotate %259 by %c126_i32_95 dim 1 : vector<16x128xf32>, i32 -> vector<16x128xf32>
    %291 = vector.broadcast %289 : f32 to vector<16x128xf32>
    %292 = arith.mulf %291, %290 : vector<16x128xf32>
    %293 = arith.addf %288, %292 : vector<16x128xf32>
    %c6_96 = arith.constant 6 : index
    %294 = memref.load %arg4[%c6_96] : memref<12xf32, #tpu.memory_space<smem>>
    %295 = vector.broadcast %294 : f32 to vector<16x128xf32>
    %296 = arith.mulf %295, %263 : vector<16x128xf32>
    %c7_97 = arith.constant 7 : index
    %297 = memref.load %arg4[%c7_97] : memref<12xf32, #tpu.memory_space<smem>>
    %c127_i32_98 = arith.constant 127 : i32
    %298 = tpu.dynamic_rotate %263 by %c127_i32_98 dim 1 : vector<16x128xf32>, i32 -> vector<16x128xf32>
    %299 = vector.broadcast %297 : f32 to vector<16x128xf32>
    %300 = arith.mulf %299, %298 : vector<16x128xf32>
    %301 = arith.addf %296, %300 : vector<16x128xf32>
    %c8_99 = arith.constant 8 : index
    %302 = memref.load %arg4[%c8_99] : memref<12xf32, #tpu.memory_space<smem>>
    %c126_i32_100 = arith.constant 126 : i32
    %303 = tpu.dynamic_rotate %263 by %c126_i32_100 dim 1 : vector<16x128xf32>, i32 -> vector<16x128xf32>
    %304 = vector.broadcast %302 : f32 to vector<16x128xf32>
    %305 = arith.mulf %304, %303 : vector<16x128xf32>
    %306 = arith.addf %301, %305 : vector<16x128xf32>
    %c9_101 = arith.constant 9 : index
    %307 = memref.load %arg4[%c9_101] : memref<12xf32, #tpu.memory_space<smem>>
    %308 = vector.broadcast %307 : f32 to vector<16x128xf32>
    %309 = arith.mulf %308, %267 : vector<16x128xf32>
    %c10_102 = arith.constant 10 : index
    %310 = memref.load %arg4[%c10_102] : memref<12xf32, #tpu.memory_space<smem>>
    %c127_i32_103 = arith.constant 127 : i32
    %311 = tpu.dynamic_rotate %267 by %c127_i32_103 dim 1 : vector<16x128xf32>, i32 -> vector<16x128xf32>
    %312 = vector.broadcast %310 : f32 to vector<16x128xf32>
    %313 = arith.mulf %312, %311 : vector<16x128xf32>
    %314 = arith.addf %309, %313 : vector<16x128xf32>
    %c11_104 = arith.constant 11 : index
    %315 = memref.load %arg4[%c11_104] : memref<12xf32, #tpu.memory_space<smem>>
    %c126_i32_105 = arith.constant 126 : i32
    %316 = tpu.dynamic_rotate %267 by %c126_i32_105 dim 1 : vector<16x128xf32>, i32 -> vector<16x128xf32>
    %317 = vector.broadcast %315 : f32 to vector<16x128xf32>
    %318 = arith.mulf %317, %316 : vector<16x128xf32>
    %319 = arith.addf %314, %318 : vector<16x128xf32>
    %c0_106 = arith.constant 0 : index
    %320 = memref.load %arg5[%c0_106] : memref<32xf32, #tpu.memory_space<smem>>
    %321 = vector.broadcast %320 : f32 to vector<16x128xf32>
    %322 = arith.mulf %321, %280 : vector<16x128xf32>
    %c1_107 = arith.constant 1 : index
    %323 = memref.load %arg5[%c1_107] : memref<32xf32, #tpu.memory_space<smem>>
    %324 = vector.broadcast %323 : f32 to vector<16x128xf32>
    %325 = arith.mulf %324, %293 : vector<16x128xf32>
    %326 = arith.addf %322, %325 : vector<16x128xf32>
    %c2_108 = arith.constant 2 : index
    %327 = memref.load %arg5[%c2_108] : memref<32xf32, #tpu.memory_space<smem>>
    %328 = vector.broadcast %327 : f32 to vector<16x128xf32>
    %329 = arith.mulf %328, %306 : vector<16x128xf32>
    %330 = arith.addf %326, %329 : vector<16x128xf32>
    %c3_109 = arith.constant 3 : index
    %331 = memref.load %arg5[%c3_109] : memref<32xf32, #tpu.memory_space<smem>>
    %332 = vector.broadcast %331 : f32 to vector<16x128xf32>
    %333 = arith.mulf %332, %319 : vector<16x128xf32>
    %334 = arith.addf %330, %333 : vector<16x128xf32>
    %c0_110 = arith.constant 0 : index
    %c0_111 = arith.constant 0 : index
    %c0_112 = arith.constant 0 : index
    %c0_113 = arith.constant 0 : index
    %335 = vector.load %arg6[%c0_110, %c0_111, %c0_112, %c0_113] : memref<1x8x16x128xf32, #tpu.memory_space<vmem>>, vector<1x1x16x128xf32>
    %336 = vector.shape_cast %335 : vector<1x1x16x128xf32> to vector<16x128xf32>
    %337 = vector.shape_cast %334 : vector<16x128xf32> to vector<1x1x16x128xf32>
    tpu.vector_store %arg6[%c0_110, %c0_111, %c0_112, %c0_113], %337 {strides = array<i32>} : memref<1x8x16x128xf32, #tpu.memory_space<vmem>>, vector<1x1x16x128xf32>,
    %c4_114 = arith.constant 4 : index
    %338 = memref.load %arg5[%c4_114] : memref<32xf32, #tpu.memory_space<smem>>
    %339 = vector.broadcast %338 : f32 to vector<16x128xf32>
    %340 = arith.mulf %339, %280 : vector<16x128xf32>
    %c5_115 = arith.constant 5 : index
    %341 = memref.load %arg5[%c5_115] : memref<32xf32, #tpu.memory_space<smem>>
    %342 = vector.broadcast %341 : f32 to vector<16x128xf32>
    %343 = arith.mulf %342, %293 : vector<16x128xf32>
    %344 = arith.addf %340, %343 : vector<16x128xf32>
    %c6_116 = arith.constant 6 : index
    %345 = memref.load %arg5[%c6_116] : memref<32xf32, #tpu.memory_space<smem>>
    %346 = vector.broadcast %345 : f32 to vector<16x128xf32>
    %347 = arith.mulf %346, %306 : vector<16x128xf32>
    %348 = arith.addf %344, %347 : vector<16x128xf32>
    %c7_117 = arith.constant 7 : index
    %349 = memref.load %arg5[%c7_117] : memref<32xf32, #tpu.memory_space<smem>>
    %350 = vector.broadcast %349 : f32 to vector<16x128xf32>
    %351 = arith.mulf %350, %319 : vector<16x128xf32>
    %352 = arith.addf %348, %351 : vector<16x128xf32>
    %c0_118 = arith.constant 0 : index
    %c1_119 = arith.constant 1 : index
    %c0_120 = arith.constant 0 : index
    %c0_121 = arith.constant 0 : index
    %353 = vector.load %arg6[%c0_118, %c1_119, %c0_120, %c0_121] : memref<1x8x16x128xf32, #tpu.memory_space<vmem>>, vector<1x1x16x128xf32>
    %354 = vector.shape_cast %353 : vector<1x1x16x128xf32> to vector<16x128xf32>
    %355 = vector.shape_cast %352 : vector<16x128xf32> to vector<1x1x16x128xf32>
    tpu.vector_store %arg6[%c0_118, %c1_119, %c0_120, %c0_121], %355 {strides = array<i32>} : memref<1x8x16x128xf32, #tpu.memory_space<vmem>>, vector<1x1x16x128xf32>,
    %c8_122 = arith.constant 8 : index
    %356 = memref.load %arg5[%c8_122] : memref<32xf32, #tpu.memory_space<smem>>
    %357 = vector.broadcast %356 : f32 to vector<16x128xf32>
    %358 = arith.mulf %357, %280 : vector<16x128xf32>
    %c9_123 = arith.constant 9 : index
    %359 = memref.load %arg5[%c9_123] : memref<32xf32, #tpu.memory_space<smem>>
    %360 = vector.broadcast %359 : f32 to vector<16x128xf32>
    %361 = arith.mulf %360, %293 : vector<16x128xf32>
    %362 = arith.addf %358, %361 : vector<16x128xf32>
    %c10_124 = arith.constant 10 : index
    %363 = memref.load %arg5[%c10_124] : memref<32xf32, #tpu.memory_space<smem>>
    %364 = vector.broadcast %363 : f32 to vector<16x128xf32>
    %365 = arith.mulf %364, %306 : vector<16x128xf32>
    %366 = arith.addf %362, %365 : vector<16x128xf32>
    %c11_125 = arith.constant 11 : index
    %367 = memref.load %arg5[%c11_125] : memref<32xf32, #tpu.memory_space<smem>>
    %368 = vector.broadcast %367 : f32 to vector<16x128xf32>
    %369 = arith.mulf %368, %319 : vector<16x128xf32>
    %370 = arith.addf %366, %369 : vector<16x128xf32>
    %c0_126 = arith.constant 0 : index
    %c2_127 = arith.constant 2 : index
    %c0_128 = arith.constant 0 : index
    %c0_129 = arith.constant 0 : index
    %371 = vector.load %arg6[%c0_126, %c2_127, %c0_128, %c0_129] : memref<1x8x16x128xf32, #tpu.memory_space<vmem>>, vector<1x1x16x128xf32>
    %372 = vector.shape_cast %371 : vector<1x1x16x128xf32> to vector<16x128xf32>
    %373 = vector.shape_cast %370 : vector<16x128xf32> to vector<1x1x16x128xf32>
    tpu.vector_store %arg6[%c0_126, %c2_127, %c0_128, %c0_129], %373 {strides = array<i32>} : memref<1x8x16x128xf32, #tpu.memory_space<vmem>>, vector<1x1x16x128xf32>,
    %c12_130 = arith.constant 12 : index
    %374 = memref.load %arg5[%c12_130] : memref<32xf32, #tpu.memory_space<smem>>
    %375 = vector.broadcast %374 : f32 to vector<16x128xf32>
    %376 = arith.mulf %375, %280 : vector<16x128xf32>
    %c13_131 = arith.constant 13 : index
    %377 = memref.load %arg5[%c13_131] : memref<32xf32, #tpu.memory_space<smem>>
    %378 = vector.broadcast %377 : f32 to vector<16x128xf32>
    %379 = arith.mulf %378, %293 : vector<16x128xf32>
    %380 = arith.addf %376, %379 : vector<16x128xf32>
    %c14_132 = arith.constant 14 : index
    %381 = memref.load %arg5[%c14_132] : memref<32xf32, #tpu.memory_space<smem>>
    %382 = vector.broadcast %381 : f32 to vector<16x128xf32>
    %383 = arith.mulf %382, %306 : vector<16x128xf32>
    %384 = arith.addf %380, %383 : vector<16x128xf32>
    %c15_133 = arith.constant 15 : index
    %385 = memref.load %arg5[%c15_133] : memref<32xf32, #tpu.memory_space<smem>>
    %386 = vector.broadcast %385 : f32 to vector<16x128xf32>
    %387 = arith.mulf %386, %319 : vector<16x128xf32>
    %388 = arith.addf %384, %387 : vector<16x128xf32>
    %c0_134 = arith.constant 0 : index
    %c3_135 = arith.constant 3 : index
    %c0_136 = arith.constant 0 : index
    %c0_137 = arith.constant 0 : index
    %389 = vector.load %arg6[%c0_134, %c3_135, %c0_136, %c0_137] : memref<1x8x16x128xf32, #tpu.memory_space<vmem>>, vector<1x1x16x128xf32>
    %390 = vector.shape_cast %389 : vector<1x1x16x128xf32> to vector<16x128xf32>
    %391 = vector.shape_cast %388 : vector<16x128xf32> to vector<1x1x16x128xf32>
    tpu.vector_store %arg6[%c0_134, %c3_135, %c0_136, %c0_137], %391 {strides = array<i32>} : memref<1x8x16x128xf32, #tpu.memory_space<vmem>>, vector<1x1x16x128xf32>,
    %c16_138 = arith.constant 16 : index
    %392 = memref.load %arg5[%c16_138] : memref<32xf32, #tpu.memory_space<smem>>
    %393 = vector.broadcast %392 : f32 to vector<16x128xf32>
    %394 = arith.mulf %393, %280 : vector<16x128xf32>
    %c17_139 = arith.constant 17 : index
    %395 = memref.load %arg5[%c17_139] : memref<32xf32, #tpu.memory_space<smem>>
    %396 = vector.broadcast %395 : f32 to vector<16x128xf32>
    %397 = arith.mulf %396, %293 : vector<16x128xf32>
    %398 = arith.addf %394, %397 : vector<16x128xf32>
    %c18_140 = arith.constant 18 : index
    %399 = memref.load %arg5[%c18_140] : memref<32xf32, #tpu.memory_space<smem>>
    %400 = vector.broadcast %399 : f32 to vector<16x128xf32>
    %401 = arith.mulf %400, %306 : vector<16x128xf32>
    %402 = arith.addf %398, %401 : vector<16x128xf32>
    %c19_141 = arith.constant 19 : index
    %403 = memref.load %arg5[%c19_141] : memref<32xf32, #tpu.memory_space<smem>>
    %404 = vector.broadcast %403 : f32 to vector<16x128xf32>
    %405 = arith.mulf %404, %319 : vector<16x128xf32>
    %406 = arith.addf %402, %405 : vector<16x128xf32>
    %c0_142 = arith.constant 0 : index
    %c4_143 = arith.constant 4 : index
    %c0_144 = arith.constant 0 : index
    %c0_145 = arith.constant 0 : index
    %407 = vector.load %arg6[%c0_142, %c4_143, %c0_144, %c0_145] : memref<1x8x16x128xf32, #tpu.memory_space<vmem>>, vector<1x1x16x128xf32>
    %408 = vector.shape_cast %407 : vector<1x1x16x128xf32> to vector<16x128xf32>
    %409 = vector.shape_cast %406 : vector<16x128xf32> to vector<1x1x16x128xf32>
    tpu.vector_store %arg6[%c0_142, %c4_143, %c0_144, %c0_145], %409 {strides = array<i32>} : memref<1x8x16x128xf32, #tpu.memory_space<vmem>>, vector<1x1x16x128xf32>,
    %c20_146 = arith.constant 20 : index
    %410 = memref.load %arg5[%c20_146] : memref<32xf32, #tpu.memory_space<smem>>
    %411 = vector.broadcast %410 : f32 to vector<16x128xf32>
    %412 = arith.mulf %411, %280 : vector<16x128xf32>
    %c21_147 = arith.constant 21 : index
    %413 = memref.load %arg5[%c21_147] : memref<32xf32, #tpu.memory_space<smem>>
    %414 = vector.broadcast %413 : f32 to vector<16x128xf32>
    %415 = arith.mulf %414, %293 : vector<16x128xf32>
    %416 = arith.addf %412, %415 : vector<16x128xf32>
    %c22_148 = arith.constant 22 : index
    %417 = memref.load %arg5[%c22_148] : memref<32xf32, #tpu.memory_space<smem>>
    %418 = vector.broadcast %417 : f32 to vector<16x128xf32>
    %419 = arith.mulf %418, %306 : vector<16x128xf32>
    %420 = arith.addf %416, %419 : vector<16x128xf32>
    %c23_149 = arith.constant 23 : index
    %421 = memref.load %arg5[%c23_149] : memref<32xf32, #tpu.memory_space<smem>>
    %422 = vector.broadcast %421 : f32 to vector<16x128xf32>
    %423 = arith.mulf %422, %319 : vector<16x128xf32>
    %424 = arith.addf %420, %423 : vector<16x128xf32>
    %c0_150 = arith.constant 0 : index
    %c5_151 = arith.constant 5 : index
    %c0_152 = arith.constant 0 : index
    %c0_153 = arith.constant 0 : index
    %425 = vector.load %arg6[%c0_150, %c5_151, %c0_152, %c0_153] : memref<1x8x16x128xf32, #tpu.memory_space<vmem>>, vector<1x1x16x128xf32>
    %426 = vector.shape_cast %425 : vector<1x1x16x128xf32> to vector<16x128xf32>
    %427 = vector.shape_cast %424 : vector<16x128xf32> to vector<1x1x16x128xf32>
    tpu.vector_store %arg6[%c0_150, %c5_151, %c0_152, %c0_153], %427 {strides = array<i32>} : memref<1x8x16x128xf32, #tpu.memory_space<vmem>>, vector<1x1x16x128xf32>,
    %c24_154 = arith.constant 24 : index
    %428 = memref.load %arg5[%c24_154] : memref<32xf32, #tpu.memory_space<smem>>
    %429 = vector.broadcast %428 : f32 to vector<16x128xf32>
    %430 = arith.mulf %429, %280 : vector<16x128xf32>
    %c25_155 = arith.constant 25 : index
    %431 = memref.load %arg5[%c25_155] : memref<32xf32, #tpu.memory_space<smem>>
    %432 = vector.broadcast %431 : f32 to vector<16x128xf32>
    %433 = arith.mulf %432, %293 : vector<16x128xf32>
    %434 = arith.addf %430, %433 : vector<16x128xf32>
    %c26_156 = arith.constant 26 : index
    %435 = memref.load %arg5[%c26_156] : memref<32xf32, #tpu.memory_space<smem>>
    %436 = vector.broadcast %435 : f32 to vector<16x128xf32>
    %437 = arith.mulf %436, %306 : vector<16x128xf32>
    %438 = arith.addf %434, %437 : vector<16x128xf32>
    %c27_157 = arith.constant 27 : index
    %439 = memref.load %arg5[%c27_157] : memref<32xf32, #tpu.memory_space<smem>>
    %440 = vector.broadcast %439 : f32 to vector<16x128xf32>
    %441 = arith.mulf %440, %319 : vector<16x128xf32>
    %442 = arith.addf %438, %441 : vector<16x128xf32>
    %c0_158 = arith.constant 0 : index
    %c6_159 = arith.constant 6 : index
    %c0_160 = arith.constant 0 : index
    %c0_161 = arith.constant 0 : index
    %443 = vector.load %arg6[%c0_158, %c6_159, %c0_160, %c0_161] : memref<1x8x16x128xf32, #tpu.memory_space<vmem>>, vector<1x1x16x128xf32>
    %444 = vector.shape_cast %443 : vector<1x1x16x128xf32> to vector<16x128xf32>
    %445 = vector.shape_cast %442 : vector<16x128xf32> to vector<1x1x16x128xf32>
    tpu.vector_store %arg6[%c0_158, %c6_159, %c0_160, %c0_161], %445 {strides = array<i32>} : memref<1x8x16x128xf32, #tpu.memory_space<vmem>>, vector<1x1x16x128xf32>,
    %c28_162 = arith.constant 28 : index
    %446 = memref.load %arg5[%c28_162] : memref<32xf32, #tpu.memory_space<smem>>
    %447 = vector.broadcast %446 : f32 to vector<16x128xf32>
    %448 = arith.mulf %447, %280 : vector<16x128xf32>
    %c29_163 = arith.constant 29 : index
    %449 = memref.load %arg5[%c29_163] : memref<32xf32, #tpu.memory_space<smem>>
    %450 = vector.broadcast %449 : f32 to vector<16x128xf32>
    %451 = arith.mulf %450, %293 : vector<16x128xf32>
    %452 = arith.addf %448, %451 : vector<16x128xf32>
    %c30_164 = arith.constant 30 : index
    %453 = memref.load %arg5[%c30_164] : memref<32xf32, #tpu.memory_space<smem>>
    %454 = vector.broadcast %453 : f32 to vector<16x128xf32>
    %455 = arith.mulf %454, %306 : vector<16x128xf32>
    %456 = arith.addf %452, %455 : vector<16x128xf32>
    %c31_165 = arith.constant 31 : index
    %457 = memref.load %arg5[%c31_165] : memref<32xf32, #tpu.memory_space<smem>>
    %458 = vector.broadcast %457 : f32 to vector<16x128xf32>
    %459 = arith.mulf %458, %319 : vector<16x128xf32>
    %460 = arith.addf %456, %459 : vector<16x128xf32>
    %c0_166 = arith.constant 0 : index
    %c7_167 = arith.constant 7 : index
    %c0_168 = arith.constant 0 : index
    %c0_169 = arith.constant 0 : index
    %461 = vector.load %arg6[%c0_166, %c7_167, %c0_168, %c0_169] : memref<1x8x16x128xf32, #tpu.memory_space<vmem>>, vector<1x1x16x128xf32>
    %462 = vector.shape_cast %461 : vector<1x1x16x128xf32> to vector<16x128xf32>
    %463 = vector.shape_cast %460 : vector<16x128xf32> to vector<1x1x16x128xf32>
    tpu.vector_store %arg6[%c0_166, %c7_167, %c0_168, %c0_169], %463 {strides = array<i32>} : memref<1x8x16x128xf32, #tpu.memory_space<vmem>>, vector<1x1x16x128xf32>,
    return
  }
  func.func @transform_1(%arg0: i32, %arg1: i32) -> i32 {
    %c0_i32 = arith.constant 0 : i32
    %c0_i32_0 = arith.constant 0 : i32
    return %c0_i32 : i32
  }
  func.func @transform_2(%arg0: i32, %arg1: i32) -> i32 {
    %c0_i32 = arith.constant 0 : i32
    %c0_i32_0 = arith.constant 0 : i32
    return %c0_i32 : i32
  }
  func.func @transform_3(%arg0: i32, %arg1: i32) -> i32 {
    %c0_i32 = arith.constant 0 : i32
    %c0_i32_0 = arith.constant 0 : i32
    return %c0_i32 : i32
  }
  func.func @transform_4(%arg0: i32, %arg1: i32) -> (i32, i32, i32, i32) {
    %c0_i32 = arith.constant 0 : i32
    %c0_i32_0 = arith.constant 0 : i32
    %c0_i32_1 = arith.constant 0 : i32
    return %arg0, %c0_i32, %arg1, %c0_i32_0 : i32, i32, i32, i32
  }
}

</mosaic_0001>

<bundles_post_ra>
// kernel: tpu_custom_call.1
= control target key start
LH: loop header
LB: loop body
LE: loop exit
PB: predicated region body
PF: predicated region fallthrough
CT: control target
= control target key end

     0   :  { %s2400_s0 = inlined_call_operand.vmem [shape: f32[2,4,18,128], index: 0, kind: input, shape index: {}]   ;;  %s2401_s1 = inlined_call_operand.vmem [shape: f32[48], index: 1, kind: input, shape index: {}]   ;;  %s2402_s2 = inlined_call_operand.vmem [shape: f32[12], index: 2, kind: input, shape index: {}]   ;;  %s2403_s3 = inlined_call_operand.vmem [shape: f32[32], index: 3, kind: input, shape index: {}]   ;;  %s2404_s4 = inlined_call_operand.hbm [shape: f32[2,8,16,128], index: 4, kind: output, shape index: {}]  }
   0x1   :  { %2421 = sst [smem:[#allocation26_spill]] %s2400_s0 }
   0x2   :  { %2422 = sst [smem:[#allocation27_spill]] %s2401_s1 }
   0x3   :  { %2423 = sst [smem:[#allocation28_spill]] %s2402_s2 }
   0x4   :  { %2424 = sst [smem:[#allocation29_spill]] %s2403_s3 }
   0x5   :  { %2425 = sst [smem:[#allocation30_spill]] %s2404_s4 }
   0x6   :  { %9 = vsyncpa [#allocation6], 0 }
   0x7   :  { %10 = vsyncpa [#allocation8], 0 }
   0x8   :  { %11 = vsyncpa [#allocation5], 0 }
   0x9   :  { %13 = vsyncpa [#allocation5 + $0x1], 0  ;;  %s1613_s15 = smov 0   ;;  %s1615_s16 = smov 0  }
   0xa   :  { %s1617_s17 = smov 0   ;;  %s1619_s18 = smov 0  }
   0xb   :  { %s1621_s19 = smov 0   ;;  %s1623_s20 = smov 0  }
   0xc LB: > { %2426 = sst [smem:[#allocation17_spill]] %s1558_s15  ;;  %s1179_s21 = sadd.s32 4294967295, %s1578_s20   ;;  %s1578_s20 = sphi %s1623_s20, %s19_s20   ;;  %s1574_s19 = sphi %s1621_s19, %s2459_s19   ;;  %s1570_s18 = sphi %s1619_s18, %s2458_s18   ;;  %s1566_s17 = sphi %s1617_s17, %s2457_s17   ;;  %s1562_s16 = sphi %s1615_s16, %s2456_s16   ;;  %s1558_s15 = sphi %s1613_s15, %s2455_s15  }
   0xd   : > { %2427 = sst [smem:[#allocation18_spill]] %s1562_s16  ;;  %s1180_s22 = sadd.s32 4294967294, %s1578_s20  }
   0xe   : > { %2428 = sst [smem:[#allocation19_spill]] %s1566_s17  ;;  %s31_s23 = sadd.s32 1, %s1574_s19 }
   0xf   : > { %2429 = sst [smem:[#allocation20_spill]] %s1574_s19  ;;  %s103_s24 = sadd.s32 1, %s1566_s17 }
  0x10   : > { %2430 = sst [smem:[#allocation21_spill]] %s1578_s20  ;;  %p33_p0 = scmp.ge.s32.totalorder %s31_s23, 2 }
  0x11   : > { %p113_p1 = scmp.ne.s32.totalorder %s1566_s17, %s1562_s16  ;;  %p114_p2 = scmp.eq.s32.totalorder %s1179_s21, 1 }
  0x12   : > { %p119_p3 = scmp.ne.s32.totalorder %s1562_s16, %s1558_s15  ;;  %s2461_s23 = smov (%p33_p0, %s31_s23), 0 }
  0x13   : > { %2431 = sst [smem:[#allocation22_spill]] %s2461_s23  ;;  %p1653_p4 = por %p114_p2, %p113_p1 }
  0x14   : > { %p120_p5 = scmp.eq.s32.totalorder %s1180_s22, 1  ;;  %s98_s26 = ssub.s32 %s1574_s19, %s2461_s23 }
  0x15   : > { %s2432_s25 = scalar_select %p1653_p4, 1, 0 }
  0x16   : > { %p1181_p6 = scmp.ge.s32.totalorder %s1578_s20, 1  ;;  %p101_p7 = scmp.eq.s32.totalorder %s98_s26, 0 }
  0x17   : > { %2433 = sst [smem:[#allocation23_spill]] %s2432_s25  ;;  %p1660_p8 = por %p120_p5, %p119_p3 }
  0x18   : > { %p127_p9 = scmp.lt.s32.totalorder %s1578_s20, 3  ;;  %p1672_p11 = scmp.eq.s32.totalorder %s1179_s21, 0 }
  0x19   : > { %s2434_s27 = scalar_select %p1660_p8, 1, 0 }
  0x1a   : > { %s1666_s28 = scalar_select %p101_p7, %s1566_s17, %s103_s24  }
  0x1b   : > { %2435 = sst [smem:[#allocation24_spill]] %s2434_s27  ;;  %p1668_p10 = pnand %p1181_p6, %p127_p9 }
  0x1c   : > { %2436 = sst [smem:[#allocation25_spill]] %s1666_s28 }
  0x1d   : > { %s2437_s29 = scalar_select %p1668_p10, 1, 0 }
  0x1e   : > { %s2438_s30 = scalar_select %p1672_p11, 1, 0 }
  0x1f   : > { %s2439_s2 = sld [smem:[#allocation28_spill]]  ;;  %p1371_p12 = pneg %p1668_p10 }
  0x20   : > { %s2440_s1 = sld [smem:[#allocation27_spill]] }
  0x21   : > { %p1686_p13 = pnand %p1672_p11, %p1371_p12  ;;  %s2442_s3 = sld [smem:[#allocation29_spill]] }
  0x23   : > { %p1449_p1 = pneg %p1686_p13 }
  0x25   : > { %s151_s7 = sshll.u32 %s2439_s2, 4  ;;  %s152_s7 = int_to_ptr.vmem [resolvable:$true] %s151_s7 }
  0x26   : > { %s140_s10 = sshll.u32 %s2440_s1, 4  ;;  %s1447_s21 = scalar_lea.vmem %s152_s7, 16  ;;  %s141_s10 = int_to_ptr.vmem [resolvable:$true] %s140_s10 }
  0x27   : > { %s162_s14 = sshll.u32 %s2442_s3, 4  ;;  %p1448_p0 = scmp.ne.s32.totalorder %s152_s7, %s1447_s21  ;;  %s163_s14 = int_to_ptr.vmem [resolvable:$true] %s162_s14 }
  0x28   : > { %p1455_p5 = scmp.lt.s32.totalorder %s152_s7, %s152_s7  ;;  %p1456_p6 = scmp.lt.s32.totalorder %s1447_s21, %s1447_s21 }
  0x29   : > { %p1450_p2 = pnand %p1449_p1, %p1448_p0 }
  0x2a   : > { %p1457_p7 = por %p1456_p6, %p1455_p5 }
  0x2b   : > { %p1451_p3 = pneg %p1450_p2 }
  0x2d   : > { %p1458_p9 = pnand %p1457_p7, %p1451_p3 }
  0x2f   : > { %1461 = shalt.err (!%p1458_p9)
}
  0x30   : > { %s1580_s22 = smov [#allocation7]   ;;  %s1462_s24 = scalar_lea.vmem %s141_s10, 16 }
  0x31   : > { %1377 = dma.vmem_to_smem (!%p1686_p13), %s152_s7, 16, %s1580_s22, [#allocation8]  }
  0x32   : > { %p1463_p12 = scmp.ne.s32.totalorder %s141_s10, %s1462_s24  ;;  %p1470_p11 = scmp.lt.s32.totalorder %s141_s10, %s141_s10 }
  0x33   : > { %p1471_p10 = scmp.lt.s32.totalorder %s1462_s24, %s1462_s24 }
  0x34   : > { %p1465_p8 = pnand %p1463_p12, %p1449_p1 }
  0x35   : > { %p1472_p0 = por %p1471_p10, %p1470_p11 }
  0x36   : > { %p1466_p4 = pneg %p1465_p8 }
  0x38   : > { %p1473_p2 = pnand %p1472_p0, %p1466_p4 }
  0x3a   : > { %1476 = shalt.err (!%p1473_p2)
}
  0x3b   : > { %s1581_s26 = smov [#allocation4]   ;;  %s1477_s5 = scalar_lea.vmem %s163_s14, 16 }
  0x3c   : > { %1374 = dma.vmem_to_smem (!%p1686_p13), %s141_s10, 16, %s1581_s26, [#allocation6]  }
  0x3d   : > { %p1478_p3 = scmp.ne.s32.totalorder %s163_s14, %s1477_s5  ;;  %p1485_p7 = scmp.lt.s32.totalorder %s163_s14, %s163_s14 }
  0x3e   : > { %p1486_p9 = scmp.lt.s32.totalorder %s1477_s5, %s1477_s5 }
  0x3f   : > { %p1480_p5 = pnand %p1478_p3, %p1449_p1 }
  0x40   : > { %p1487_p8 = por %p1486_p9, %p1485_p7 }
  0x41   : > { %p1481_p6 = pneg %p1480_p5 }
  0x43   : > { %p1488_p12 = pnand %p1487_p8, %p1481_p6 }
  0x45   : > { %1491 = shalt.err (!%p1488_p12)
}
  0x46   : > { %s1582_s6 = smov [#allocation9]   ;;  %p2443_p4 = scmp.ne.s32.totalorder %s2437_s29, 0 }
  0x47   : > { %1380 = dma.vmem_to_smem (!%p1686_p13), %s163_s14, 16, %s1582_s6, [#allocation8]  }
  0x48   : > { %175 = sbr.rel (%p2443_p4) target bundleno = 324 (0x144), region = 32  ;;  %p2444_p10 = scmp.ne.s32.totalorder (!%p2443_p4), %s2438_s30, 0 }
  0x4d   : > { %1543 = dma.done.wait (%p2444_p10), [#allocation6], 16  }
  0x4e   : > { %1545 = vsyncadd (%p2444_p10), [#allocation6], 4294967280 }
  0x4f   : > { %1547 = dma.done.wait (%p2444_p10), [#allocation8], 32  }
  0x50   : > { %1549 = vsyncadd (%p2444_p10), [#allocation8], 4294967264 }
  0x51   : > { %189 = sfence }
  0x52   : > { %s2409_s7 = sand.u32 1, %s1562_s16   ;;  %s220_s8 = smul.u32 96, %s1570_s18 }
  0x53   : > { %s1189_s29 = sshll.u32 %s2409_s7, 7  ;;  %s2445_s0 = sld [smem:[#allocation26_spill]] }
  0x54   : > { %s1727_s30 = scalar_lea.vmem [#allocation10], %s1189_s29 }
  0x59   : > { %s221_s11 = scalar_lea.vmem %s2445_s0, %s220_s8 }
  0x5a   : > { %v266_v0 = vld [vmem:[%s221_s11] sm:$0xff]  ;;  %v268_v1 = vld [vmem:[%s221_s11 + $0x8] sm:$0xff]  ;;  %v270_v2 = vld [vmem:[%s221_s11 + $0x18] sm:$0xff] }
  0x5b   : > { %267 = vst [vmem:[#allocation2] sm:$0xff] %v266_v0  ;;  %269 = vst [vmem:[#allocation2 + $0x8] sm:$0xff] %v268_v1  ;;  %v272_v3 = vld [vmem:[%s221_s11 + $0x20] sm:$0xff]  ;;  %v274_v4 = vld [vmem:[%s221_s11 + $0x30] sm:$0xff] }
  0x5c   : > { %271 = vst [vmem:[#allocation2 + $0x18] sm:$0xff] %v270_v2  ;;  %v276_v5 = vld [vmem:[%s221_s11 + $0x38] sm:$0xff]  ;;  %273 = vst [vmem:[#allocation2 + $0x20] sm:$0xff] %v272_v3  ;;  %v278_v6 = vld [vmem:[%s221_s11 + $0x48] sm:$0xff] }
  0x5d   : > { %275 = vst [vmem:[#allocation2 + $0x30] sm:$0xff] %v274_v4  ;;  %277 = vst [vmem:[#allocation2 + $0x38] sm:$0xff] %v276_v5  ;;  %v280_v7 = vld [vmem:[%s221_s11 + $0x50] sm:$0xff]  ;;  %v1191_v9 = vld [vmem:[%s221_s11 + $0x28] sm:$0x3] }
  0x5e   : > { %v1190_v8 = vld [vmem:[%s221_s11 + $0x10] sm:$0x3]  ;;  %279 = vst [vmem:[#allocation2 + $0x48] sm:$0xff] %v278_v6  ;;  %281 = vst [vmem:[#allocation2 + $0x50] sm:$0xff] %v280_v7  ;;  %v1192_v10 = vld [vmem:[%s221_s11 + $0x40] sm:$0x3] }
  0x5f   : > { %293 = vst [vmem:[#allocation2 + $0x10] sm:$0x3] %v1190_v8  ;;  %v1193_v11 = vld [vmem:[%s221_s11 + $0x58] sm:$0x3]  ;;  %295 = vst [vmem:[#allocation2 + $0x28] sm:$0x3] %v1191_v9 }
  0x60   : > { %297 = vst [vmem:[#allocation2 + $0x40] sm:$0x3] %v1192_v10  ;;  %299 = vst [vmem:[#allocation2 + $0x58] sm:$0x3] %v1193_v11 }
  0x61   : > { %303 = vsyncadd [#allocation3], 1152 }
  0x62   : > { %1550 = dma.done.wait [#allocation3], 1152 }
  0x63   : > { %1551 = vsyncadd [#allocation3], 4294966144  ;;  %s1729_s12 = sld [smem:[#allocation4 + $0xc]]  ;;  %v1741_v12 = vld [vmem:[#allocation2] sm:$0xff]  ;;  %v1752_v18 = vld [vmem:[#allocation2 + $0x18] sm:$0xff] }
  0x64   : > { %s1731_s13 = sld [smem:[#allocation4 + $0xd]]  ;;  %v1744_v14 = vld [vmem:[#allocation2 + $0x1] sm:$0xff]  ;;  %v1762_v23 = vld [vmem:[#allocation2 + $0x19] sm:$0xff]  ;;  %v1791_v39 = vld [vmem:[#allocation2 + $0x30] sm:$0xff] }
  0x65   : > { %s1733_s14 = sld [smem:[#allocation4 + $0xe]]  ;;  %v1746_v15 = vld [vmem:[#allocation2 + $0x2] sm:$0xff]  ;;  %v1776_v30 = vld [vmem:[#allocation2 + $0x1a] sm:$0xff]  ;;  %v1798_v45 = vld [vmem:[#allocation2 + $0x31] sm:$0xff] }
  0x66   : > { %s1735_s21 = sld [smem:[#allocation4 + $0xf]]  ;;  %v1770_v27 = vld [vmem:[#allocation2 + $0x8] sm:$0xff]  ;;  %v1783_v34 = vld [vmem:[#allocation2 + $0x20] sm:$0xff]  ;;  %v1801_v47 = vld [vmem:[#allocation2 + $0x32] sm:$0xff] }
  0x67   : > { %s1737_s22 = sld [smem:[#allocation4 + $0x10]]  ;;  %v1772_v28 = vld [vmem:[#allocation2 + $0x9] sm:$0xff]  ;;  %v1789_v38 = vld [vmem:[#allocation2 + $0x21] sm:$0xff]  ;;  %v1814_v54 = vld [vmem:[#allocation2 + $0x38] sm:$0xff] }
  0x68   : > { %s1739_s24 = sld [smem:[#allocation4 + $0x11]]  ;;  %v1774_v29 = vld [vmem:[#allocation2 + $0xa] sm:$0xff]  ;;  %v1806_v49 = vld [vmem:[#allocation2 + $0x22] sm:$0xff]  ;;  %v1832_v3 = vld [vmem:[#allocation2 + $0x39] sm:$0xff] }
  0x69   : > { %v415_v13 = vstv %s1729_s12  ;;  %s1748_s26 = sld [smem:[#allocation4 + $0x12]]  ;;  %v1808_v50 = vld [vmem:[#allocation2 + $0x48] sm:$0xff] }
  0x6a   : > { %v416_v16 = vmul.f32 %v415_v13, %v1741_v12  ;;  %v441_v17 = vstv %s1731_s13  ;;  %s1754_s5 = sld [smem:[#allocation4 + $0x13]]  ;;  %v417_v32 = vmul.f32 %v415_v13, %v1770_v27  ;;  %v1817_v57 = vld [vmem:[#allocation2 + $0x49] sm:$0xff]  ;;  %v1844_v13 = vld [vmem:[#allocation2 + $0x3a] sm:$0xff] }
  0x6b   : > { %v442_v19 = vmul.f32 %v441_v17, %v1744_v14  ;;  %v467_v20 = vstv %s1733_s14  ;;  %s1758_s6 = sld [smem:[#allocation4 + $0x14]]  ;;  %v443_v33 = vmul.f32 %v441_v17, %v1772_v28 }
  0x6c   : > { %v468_v21 = vmul.f32 %v467_v20, %v1746_v15  ;;  %v494_v22 = vstv %s1735_s21  ;;  %s1764_s8 = sld [smem:[#allocation4 + $0x15]]  ;;  %v469_v37 = vmul.f32 %v467_v20, %v1774_v29 }
  0x6d   : > { %v444_v24 = vadd.f32 %v442_v19, %v416_v16  ;;  %v495_v25 = vmul.f32 %v1752_v18, %v494_v22  ;;  %v520_v26 = vstv %s1737_s22  ;;  %s1768_s29 = sld [smem:[#allocation4 + $0x16]]  ;;  %v445_v41 = vadd.f32 %v443_v33, %v417_v32  ;;  %v1846_v16 = vld [vmem:[#allocation2 + $0x4a] sm:$0xff] }
  0x6e   : > { %v546_v31 = vstv %s1739_s24  ;;  %s1779_s9 = sld [smem:[#allocation4 + $0x17]]  ;;  %v521_v36 = vmul.f32 %v1762_v23, %v520_v26  ;;  %v496_v42 = vmul.f32 %v1783_v34, %v494_v22  ;;  %v522_v53 = vmul.f32 %v1789_v38, %v520_v26 }
  0x6f   : > { %v470_v35 = vadd.f32 %v468_v21, %v444_v24  ;;  %s1786_s10 = sld [smem:[#allocation4]]  ;;  %v573_v40 = vstv %s1748_s26  ;;  %v547_v44 = vmul.f32 %v1776_v30, %v546_v31  ;;  %v471_v52 = vadd.f32 %v469_v37, %v445_v41 }
  0x70   : > { %s1794_s11 = sld [smem:[#allocation4 + $0x1]]  ;;  %v599_v46 = vstv %s1754_s5  ;;  %v574_v56 = vmul.f32 %v1791_v39, %v573_v40  ;;  %v548_v62 = vmul.f32 %v1806_v49, %v546_v31  ;;  %v575_v2 = vmul.f32 %v1814_v54, %v573_v40  ;;  %v1857_v31 = vld [vmem:[#allocation2 + $0x50] sm:$0xff] }
  0x71   : > { %v497_v43 = vadd.f32 %v495_v25, %v470_v35  ;;  %v625_v48 = vstv %s1758_s6  ;;  %s1804_s12 = sld [smem:[#allocation4 + $0x2]]  ;;  %v600_v59 = vmul.f32 %v1798_v45, %v599_v46  ;;  %v498_v61 = vadd.f32 %v496_v42, %v471_v52 }
  0x72   : > { %v652_v51 = vstv %s1764_s8  ;;  %s1811_s13 = sld [smem:[#allocation4 + $0x3]]  ;;  %v626_v60 = vmul.f32 %v1801_v47, %v625_v48  ;;  %v601_v21 = vmul.f32 %v1832_v3, %v599_v46  ;;  %v627_v35 = vmul.f32 %v1844_v13, %v625_v48 }
  0x73   : > { %v523_v55 = vadd.f32 %v521_v36, %v497_v43  ;;  %v678_v58 = vstv %s1768_s29  ;;  %s1820_s14 = sld [smem:[#allocation4 + $0x4]]  ;;  %v653_v0 = vmul.f32 %v1808_v50, %v652_v51  ;;  %v524_v7 = vadd.f32 %v522_v53, %v498_v61  ;;  %v1863_v36 = vld [vmem:[#allocation2 + $0x51] sm:$0xff] }
  0x74   : > { %s1824_s21 = sld [smem:[#allocation4 + $0x5]]  ;;  %v679_v4 = vmul.f32 %v1817_v57, %v678_v58  ;;  %v704_v9 = vstv %s1779_s9  ;;  %v654_v53 = vmul.f32 %v1857_v31, %v652_v51 }
  0x75   : > { %v549_v63 = vadd.f32 %v547_v44, %v523_v55  ;;  %v409_v1 = vstv %s1786_s10  ;;  %s1829_s22 = sld [smem:[#allocation4 + $0x6]]  ;;  %v550_v20 = vadd.f32 %v548_v62, %v524_v7  ;;  %v705_v41 = vmul.f32 %v1846_v16, %v704_v9  ;;  %v1868_v44 = vld [vmem:[#allocation2 + $0x52] sm:$0xff] }
  0x76   : > { %v410_v5 = vmul.f32 %v409_v1, %v1741_v12  ;;  %v435_v6 = vstv %s1794_s11  ;;  %s1837_s24 = sld [smem:[#allocation4 + $0x7]]  ;;  %v411_v37 = vmul.f32 %v409_v1, %v1770_v27 }
  0x77   : > { %v576_v8 = vadd.f32 %v574_v56, %v549_v63  ;;  %v436_v10 = vmul.f32 %v435_v6, %v1744_v14  ;;  %v461_v11 = vstv %s1804_s12  ;;  %s1842_s26 = sld [smem:[#allocation4 + $0x8]]  ;;  %v577_v33 = vadd.f32 %v575_v2, %v550_v20 }
  0x78   : > { %v462_v17 = vmul.f32 %v461_v11, %v1746_v15  ;;  %v488_v19 = vstv %s1811_s13  ;;  %s1850_s5 = sld [smem:[#allocation4 + $0x9]]  ;;  %v437_v48 = vmul.f32 %v435_v6, %v1772_v28  ;;  %v706_v63 = vmul.f32 %v1868_v44, %v704_v9 }
  0x79   : > { %v602_v22 = vadd.f32 %v600_v59, %v576_v8  ;;  %v438_v24 = vadd.f32 %v436_v10, %v410_v5  ;;  %v489_v25 = vmul.f32 %v1752_v18, %v488_v19  ;;  %v514_v26 = vstv %s1820_s14  ;;  %s1855_s6 = sld [smem:[#allocation4 + $0xa]] }
  0x7a   : > { %v540_v32 = vstv %s1824_s21  ;;  %s1860_s8 = sld [smem:[#allocation4 + $0xb]]  ;;  %v515_v43 = vmul.f32 %v1762_v23, %v514_v26  ;;  %v603_v52 = vadd.f32 %v601_v21, %v577_v33  ;;  %v439_v51 = vadd.f32 %v437_v48, %v411_v37  ;;  %s1583_s21 = smov 127  }
  0x7b   : > { %v628_v40 = vadd.f32 %v626_v60, %v602_v22  ;;  %v464_v42 = vadd.f32 %v462_v17, %v438_v24  ;;  %s1870_s29 = sld [smem:[#allocation4 + $0x18]]  ;;  %v567_v46 = vstv %s1829_s22  ;;  %v541_v59 = vmul.f32 %v1776_v30, %v540_v32 }
  0x7c   : > { %s1875_s9 = sld [smem:[#allocation4 + $0x19]]  ;;  %v680_v60 = vmul.f32 %v1863_v36, %v678_v58  ;;  %v593_v61 = vstv %s1837_s24  ;;  %v629_v62 = vadd.f32 %v627_v35, %v603_v52  ;;  %v568_v5 = vmul.f32 %v1791_v39, %v567_v46 }
  0x7d   : > { %v655_v55 = vadd.f32 %v653_v0, %v628_v40  ;;  %v491_v56 = vadd.f32 %v489_v25, %v464_v42  ;;  %s1879_s10 = sld [smem:[#allocation4 + $0x1a]]  ;;  %v619_v0 = vstv %s1842_s26  ;;  %v463_v58 = vmul.f32 %v461_v11, %v1774_v29 }
  0x7e   : > { %s1883_s11 = sld [smem:[#allocation4 + $0x1b]]  ;;  %v646_v6 = vstv %s1850_s5  ;;  %v656_v8 = vadd.f32 %v654_v53, %v629_v62  ;;  %v594_v9 = vmul.f32 %v1798_v45, %v593_v61  ;;  %v490_v20 = vmul.f32 %v1783_v34, %v488_v19 }
  0x7f   : > { %v681_v1 = vadd.f32 %v679_v4, %v655_v55  ;;  %v517_v2 = vadd.f32 %v515_v43, %v491_v56  ;;  %s1887_s12 = sld [smem:[#allocation4 + $0x1c]]  ;;  %v672_v7 = vstv %s1855_s6  ;;  %v465_v21 = vadd.f32 %v463_v58, %v439_v51 }
  0x80   : > { %s1896_s13 = sld [smem:[#allocation4 + $0x1d]]  ;;  %v682_v4 = vadd.f32 %v680_v60, %v656_v8  ;;  %v516_v22 = vmul.f32 %v1789_v38, %v514_v26  ;;  %v620_v24 = vmul.f32 %v1801_v47, %v619_v0  ;;  %v647_v25 = vmul.f32 %v1808_v50, %v646_v6 }
  0x81   : > { %v1892_v10 = vadd.f32 %v705_v41, %v681_v1  ;;  %v543_v17 = vadd.f32 %v541_v59, %v517_v2  ;;  %s1899_s14 = sld [smem:[#allocation4 + $0x1e]]  ;;  %v673_v19 = vmul.f32 %v1817_v57, %v672_v7  ;;  %v698_v33 = vstv %s1860_s8 }
  0x82   : > { %s1906_s22 = sld [smem:[#allocation4 + $0x1f]]  ;;  %v1909_v26 = vadd.f32 %v706_v63, %v682_v4  ;;  %v492_v35 = vadd.f32 %v490_v20, %v465_v21  ;;  %v542_v37 = vmul.f32 %v1806_v49, %v540_v32  ;;  %v569_v41 = vmul.f32 %v1814_v54, %v567_v46 }
  0x83   : > { %750 = vrot.lane.b32.xlu1 %v1892_v10, %s1583_s21  ;;  %v570_v11 = vadd.f32 %v568_v5, %v543_v17  ;;  %s1912_s24 = sld [smem:[#allocation4 + $0x20]]  ;;  %v421_v42 = vstv %s1870_s29  ;;  %v447_v43 = vstv %s1875_s9  ;;  %v473_v55 = vstv %s1879_s10 }
  0x84   : > { %s1917_s26 = sld [smem:[#allocation4 + $0x21]]  ;;  %v518_v52 = vadd.f32 %v516_v22, %v492_v35  ;;  %v423_v53 = vmul.f32 %v421_v42, %v1770_v27  ;;  %v449_v48 = vmul.f32 %v447_v43, %v1772_v28  ;;  %v475_v56 = vmul.f32 %v473_v55, %v1774_v29 }
  0x85   : > { %v596_v40 = vadd.f32 %v594_v9, %v570_v11  ;;  %s1922_s5 = sld [smem:[#allocation4 + $0x22]]  ;;  %v500_v46 = vstv %s1883_s11  ;;  %v526_v59 = vstv %s1887_s12  ;;  %v595_v62 = vmul.f32 %v1832_v3, %v593_v61 }
  0x86   : > { %v544_v60 = vadd.f32 %v542_v37, %v518_v52  ;;  %v451_v63 = vadd.f32 %v449_v48, %v423_v53  ;;  %v502_v51 = vmul.f32 %v1783_v34, %v500_v46  ;;  %s1931_s6 = sld [smem:[#allocation4 + $0x23]]  ;;  %v699_v2 = vmul.f32 %v1846_v16, %v698_v33 }
  0x87   : > { %v622_v32 = vadd.f32 %v620_v24, %v596_v40  ;;  %752 = vrot.lane.b32.xlu1 %v1909_v26, %s1583_s21  ;;  %v552_v5 = vstv %s1896_s13  ;;  %s1935_s8 = sld [smem:[#allocation4 + $0x24]]  ;;  %v621_v58 = vmul.f32 %v1844_v13, %v619_v0  ;;  %v528_v61 = vmul.f32 %v1789_v38, %v526_v59 }
  0x88   : > { %v571_v8 = vadd.f32 %v569_v41, %v544_v60  ;;  %v477_v17 = vadd.f32 %v475_v56, %v451_v63  ;;  %s1939_s29 = sld [smem:[#allocation4 + $0x25]]  ;;  %v648_v20 = vmul.f32 %v1857_v31, %v646_v6  ;;  %v674_v4 = vmul.f32 %v1863_v36, %v672_v7 }
  0x89   : > { %v649_v1 = vadd.f32 %v647_v25, %v622_v32  ;;  %v579_v21 = vstv %s1899_s14  ;;  %s1944_s9 = sld [smem:[#allocation4 + $0x26]]  ;;  %v554_v24 = vmul.f32 %v1806_v49, %v552_v5  ;;  %v605_v0 = vstv %s1906_s22 }
  0x8a   : > { %v597_v22 = vadd.f32 %v595_v62, %v571_v8  ;;  %v504_v11 = vadd.f32 %v502_v51, %v477_v17  ;;  %s1948_s10 = sld [smem:[#allocation4 + $0x27]]  ;;  %v631_v35 = vstv %s1912_s24  ;;  %v422_v6 = vmul.f32 %v421_v42, %v1741_v12 }
  0x8b   : > { %v675_v9 = vadd.f32 %v673_v19, %v649_v1  ;;  %v658_v19 = vstv %s1917_s26  ;;  %s1955_s11 = sld [smem:[#allocation4 + $0x28]]  ;;  %v581_v40 = vmul.f32 %v1814_v54, %v579_v21  ;;  %v684_v41 = vstv %s1922_s5 }
  0x8c   : > { %v623_v7 = vadd.f32 %v621_v58, %v597_v22  ;;  %v530_v37 = vadd.f32 %v528_v61, %v504_v11  ;;  %v700_v52 = vmul.f32 %v1868_v44, %v698_v33  ;;  %v607_v53 = vmul.f32 %v1832_v3, %v605_v0  ;;  %s1965_s12 = sld [smem:[#allocation4 + $0x29]] }
  0x8d   : > { %v1950_v25 = vadd.f32 %v699_v2, %v675_v9  ;;  %v448_v48 = vmul.f32 %v447_v43, %v1744_v14  ;;  %v474_v42 = vmul.f32 %v473_v55, %v1746_v15  ;;  %v633_v60 = vmul.f32 %v1844_v13, %v631_v35  ;;  %s1978_s13 = sld [smem:[#allocation4 + $0x2a]] }
  0x8e   : > { %v650_v32 = vadd.f32 %v648_v20, %v623_v7  ;;  %v556_v56 = vadd.f32 %v554_v24, %v530_v37  ;;  %v660_v62 = vmul.f32 %v1857_v31, %v658_v19  ;;  %v686_v33 = vmul.f32 %v1863_v36, %v684_v41  ;;  %s1985_s14 = sld [smem:[#allocation4 + $0x2b]] }
  0x8f   : > { %726 = vrot.lane.b32.xlu0 %v1950_v25, %s1583_s21  ;;  %v710_v63 = vstv %s1931_s6  ;;  %v450_v43 = vadd.f32 %v448_v48, %v422_v6  ;;  %v501_v55 = vmul.f32 %v1752_v18, %v500_v46  ;;  %v527_v2 = vmul.f32 %v1762_v23, %v526_v59  ;;  %s1994_s22 = sld [smem:[#allocation4 + $0x2c]] }
  0x90   : > { %v676_v51 = vadd.f32 %v674_v4, %v650_v32  ;;  %v583_v1 = vadd.f32 %v581_v40, %v556_v56  ;;  %v553_v8 = vmul.f32 %v1776_v30, %v552_v5  ;;  %v427_v17 = vstv %s1935_s8  ;;  %s1584_s8 = smov 126   ;;  %s2081_s24 = sld [smem:[#allocation7 + $0x3]] }
  0x91   : > { %v476_v58 = vadd.f32 %v474_v42, %v450_v43  ;;  %v453_v61 = vstv %s1939_s29  ;;  %v479_v9 = vstv %s1944_s9  ;;  %v429_v46 = vmul.f32 %v427_v17, %v1770_v27  ;;  %s2003_s29 = sld [smem:[#allocation4 + $0x2d]] }
  0x92   : > { %v1987_v20 = vadd.f32 %v700_v52, %v676_v51  ;;  %v609_v22 = vadd.f32 %v607_v53, %v583_v1  ;;  %v455_v4 = vmul.f32 %v453_v61, %v1772_v28  ;;  %v481_v59 = vmul.f32 %v479_v9, %v1774_v29  ;;  %s2011_s9 = sld [smem:[#allocation4 + $0x2e]] }
  0x93   : > { %v503_v11 = vadd.f32 %v501_v55, %v476_v58  ;;  %v506_v24 = vstv %s1948_s10  ;;  %v532_v5 = vstv %s1955_s11  ;;  %v580_v37 = vmul.f32 %v1791_v39, %v579_v21  ;;  %s2025_s10 = sld [smem:[#allocation4 + $0x2f]] }
  0x94   : > { %728 = vrot.lane.b32.xlu0 %v1987_v20, %s1583_s21  ;;  %738 = vrot.lane.b32.xlu1 %v1987_v20, %s1584_s8  ;;  %v635_v6 = vadd.f32 %v633_v60, %v609_v22  ;;  %v457_v27 = vadd.f32 %v455_v4, %v429_v46  ;;  %v508_v28 = vmul.f32 %v1783_v34, %v506_v24  ;;  %v558_v29 = vstv %s1965_s12  ;;  %s2083_s26 = sld [smem:[#allocation7 + $0x4]] }
  0x95   : > { %v529_v7 = vadd.f32 %v527_v2, %v503_v11  ;;  %v712_v52 = vmul.f32 %v1868_v44, %v710_v63  ;;  %v534_v48 = vmul.f32 %v1789_v38, %v532_v5  ;;  %v606_v32 = vmul.f32 %v1798_v45, %v605_v0  ;;  %s2085_s5 = sld [smem:[#allocation7]] }
  0x96   : > { %v662_v40 = vadd.f32 %v660_v62, %v635_v6  ;;  %v483_v53 = vadd.f32 %v481_v59, %v457_v27  ;;  %v585_v34 = vstv %s1978_s13  ;;  %v560_v60 = vmul.f32 %v1806_v49, %v558_v29  ;;  %s2087_s6 = sld [smem:[#allocation7 + $0x1]] }
  0x97   : > { %v555_v42 = vadd.f32 %v553_v8, %v529_v7  ;;  %v632_v38 = vmul.f32 %v1801_v47, %v631_v35  ;;  %v659_v0 = vmul.f32 %v1808_v50, %v658_v19  ;;  %v611_v43 = vstv %s1985_s14  ;;  %s2089_s11 = sld [smem:[#allocation7 + $0x2]] }
  0x98   : > { %736 = vrot.lane.b32.xlu0 %v1950_v25, %s1584_s8  ;;  %762 = vrot.lane.b32.xlu1 %v1909_v26, %s1584_s8  ;;  %v688_v21 = vadd.f32 %v686_v33, %v662_v40  ;;  %v510_v56 = vadd.f32 %v508_v28, %v483_v53  ;;  %v587_v33 = vmul.f32 %v1814_v54, %v585_v34  ;;  %v637_v2 = vstv %s1994_s22  ;;  %s2091_s12 = sld [smem:[#allocation9]] }
  0x99   : > { %v582_v62 = vadd.f32 %v580_v37, %v555_v42  ;;  %v428_v49 = vmul.f32 %v427_v17, %v1741_v12  ;;  %v454_v35 = vmul.f32 %v453_v61, %v1744_v14  ;;  %v480_v8 = vmul.f32 %v479_v9, %v1746_v15  ;;  %s2093_s13 = sld [smem:[#allocation9 + $0x4]] }
  0x9a   : > { %v2027_v55 = vadd.f32 %v712_v52, %v688_v21  ;;  %v536_v51 = vadd.f32 %v534_v48, %v510_v56  ;;  %v685_v19 = vmul.f32 %v1817_v57, %v684_v41  ;;  %v613_v54 = vmul.f32 %v1832_v3, %v611_v43  ;;  %s2095_s14 = sld [smem:[#allocation9 + $0x8]] }
  0x9b   : > { %v608_v1 = vadd.f32 %v606_v32, %v582_v62  ;;  %v664_v17 = vstv %s2003_s29  ;;  %v456_v22 = vadd.f32 %v454_v35, %v428_v49  ;;  %v507_v14 = vmul.f32 %v1752_v18, %v506_v24  ;;  %s2099_s22 = sld [smem:[#allocation9 + $0x10]] }
  0x9c   : > { %760 = vrot.lane.b32.xlu0 %v1892_v10, %s1584_s8  ;;  %776 = vrot.lane.b32.xlu1 %v2027_v55, %s1583_s21  ;;  %v562_v58 = vadd.f32 %v560_v60, %v536_v51  ;;  %v711_v15 = vmul.f32 %v1846_v16, %v710_v63  ;;  %v639_v9 = vmul.f32 %v1844_v13, %v637_v2  ;;  %v690_v4 = vstv %s2011_s9  ;;  %s2103_s29 = sld [smem:[#allocation9 + $0x18]] }
  0x9d   : > { %v634_v12 = vadd.f32 %v632_v38, %v608_v1  ;;  %v482_v11 = vadd.f32 %v480_v8, %v456_v22  ;;  %v533_v41 = vmul.f32 %v1762_v23, %v532_v5  ;;  %v666_v59 = vmul.f32 %v1857_v31, %v664_v17  ;;  %s2105_s9 = sld [smem:[#allocation9 + $0x1c]] }
  0x9e   : > { %v589_v61 = vadd.f32 %v587_v33, %v562_v58  ;;  %v716_v27 = vstv %s2025_s10  ;;  %v559_v24 = vmul.f32 %v1776_v30, %v558_v29  ;;  %v692_v28 = vmul.f32 %v1863_v36, %v690_v4  ;;  %s2107_s10 = sld [smem:[#allocation7 + $0x5]] }
  0x9f   : > { %v661_v46 = vadd.f32 %v659_v0, %v634_v12  ;;  %v509_v18 = vadd.f32 %v507_v14, %v482_v11  ;;  %v586_v37 = vmul.f32 %v1791_v39, %v585_v34  ;;  %v718_v5 = vmul.f32 %v1868_v44, %v716_v27  ;;  %s2109_s7 = sld [smem:[#allocation9 + $0x1]] }
  0xa0   : > { %786 = vrot.lane.b32.xlu1 %v2027_v55, %s1584_s8  ;;  %v615_v3 = vadd.f32 %v613_v54, %v589_v61  ;;  %v612_v40 = vmul.f32 %v1798_v45, %v611_v43  ;;  %v638_v30 = vmul.f32 %v1801_v47, %v637_v2  ;;  %v665_v39 = vmul.f32 %v1808_v50, %v664_v17  ;;  %s2111_s0 = sld [smem:[#allocation9 + $0x5]] }
  0xa1   : > { %v687_v6 = vadd.f32 %v685_v19, %v661_v46  ;;  %v535_v7 = vadd.f32 %v533_v41, %v509_v18  ;;  %v691_v48 = vmul.f32 %v1817_v57, %v690_v4  ;;  %v717_v45 = vmul.f32 %v1846_v16, %v716_v27  ;;  %s2113_s1 = sld [smem:[#allocation9 + $0x9]] }
  0xa2   : > { %v641_v63 = vadd.f32 %v639_v9, %v615_v3  ;;  %s2115_s2 = sld [smem:[#allocation9 + $0xd]]  ;;  %v746_v57 = vstv %s2081_s24  ;;  %v722_v16 = vstv %s2085_s5  ;;  %v754_v56 = vstv %s2083_s26 }
  0xa3   : > { %v2056_v13 = vadd.f32 %v711_v15, %v687_v6  ;;  %v561_v31 = vadd.f32 %v559_v24, %v535_v7  ;;  %s2117_s3 = sld [smem:[#allocation9 + $0x11]]  ;;  %v747_v60 = vmul.f32 %v746_v57, %v1892_v10  ;;  %v730_v62 = vstv %s2087_s6 }
  0xa4   : > { %v668_v23 = vadd.f32 %v666_v59, %v641_v63  ;;  %s2119_s23 = sld [smem:[#allocation9 + $0x15]]  ;;  %v723_v38 = vmul.f32 %v722_v16, %v1950_v25  ;;  %v748_v0 = vmul.f32 %v746_v57, %v1909_v26  ;;  %v724_v43 = vmul.f32 %v722_v16, %v1987_v20 }
  0xa5   : > { %774 = vrot.lane.b32.xlu0 %v2056_v13, %s1583_s21  ;;  %v588_v53 = vadd.f32 %v586_v37, %v561_v31  ;;  %s2121_s19 = sld [smem:[#allocation9 + $0x19]]  ;;  %v740_v51 = vstv %s2089_s11  ;;  %v818_v33 = vstv %s2091_s12  ;;  %v842_v49 = vstv %s2093_s13 }
  0xa6   : > { %v694_v52 = vadd.f32 %v692_v28, %v668_v23  ;;  %s2123_s28 = sld [smem:[#allocation9 + $0x1d]]  ;;  %v867_v1 = vstv %s2095_s14  ;;  %v917_v25 = vstv %s2099_s22  ;;  %v967_v2 = vstv %s2103_s29 }
  0xa7   : > { %v614_v36 = vadd.f32 %v612_v40, %v588_v53  ;;  %s2125_s17 = sld [smem:[#allocation7 + $0x6]]  ;;  %v992_v35 = vstv %s2105_s9  ;;  %v764_v19 = vstv %s2107_s10  ;;  %v822_v58 = vstv %s2109_s7 }
  0xa8   : > { %v2064_v29 = vadd.f32 %v718_v5, %v694_v52  ;;  %s2127_s27 = sld [smem:[#allocation7 + $0x7]]  ;;  %v846_v54 = vstv %s2111_s0  ;;  %v871_v22 = vstv %s2113_s1  ;;  %v896_v15 = vstv %s2115_s2 }
  0xa9   : > { %784 = vrot.lane.b32.xlu0 %v2056_v13, %s1584_s8  ;;  %v640_v44 = vadd.f32 %v638_v30, %v614_v36  ;;  %s2129_s15 = sld [smem:[#allocation7 + $0x8]]  ;;  %v921_v61 = vstv %s2117_s3 }
  0xaa   : > { %800 = vrot.lane.b32.xlu1 %v2064_v29, %s1583_s21  ;;  %s2131_s20 = sld [smem:[#allocation9 + $0x2]]  ;;  %v946_v9 = vstv %s2119_s23 }
  0xab   : > { %v667_v42 = vadd.f32 %v665_v39, %v640_v44  ;;  %s2134_s25 = sld [smem:[#allocation9 + $0x6]]  ;;  %v971_v46 = vstv %s2121_s19 }
  0xac   : > { %s2137_s4 = sld [smem:[#allocation9 + $0xa]]  ;;  %v996_v3 = vstv %s2123_s28 }
  0xad   : > { %v693_v47 = vadd.f32 %v691_v48, %v667_v42  ;;  %s2139_s16 = sld [smem:[#allocation9 + $0xe]]  ;;  %v770_v14 = vstv %s2125_s17 }
  0xae   : > { %810 = vrot.lane.b32.xlu1 %v2064_v29, %s1584_s8  ;;  %s2143_s24 = sld [smem:[#allocation9 + $0x12]]  ;;  %v772_v18 = vmul.f32 %v770_v14, %v2027_v55  ;;  %v778_v24 = vstv %s2127_s27  ;;  %v2179_v63 = vmul.f32 %v770_v14, %v2056_v13 }
  0xaf   : > { %v2075_v32 = vadd.f32 %v717_v45, %v693_v47  ;;  %s2149_s5 = sld [smem:[#allocation9 + $0x16]]  ;;  %v788_v23 = vstv %s2129_s15 }
  0xb0   : > { %s2155_s26 = sld [smem:[#allocation9 + $0x1a]]  ;;  %v828_v5 = vstv %s2131_s20 }
  0xb1   : > { %798 = vrot.lane.b32.xlu0 %v2075_v32, %s1583_s21  ;;  %s2097_s21 = sld [smem:[#allocation9 + $0xc]]  ;;  %v852_v31 = vstv %s2134_s25 }
  0xb2   : > { %s2161_s6 = sld [smem:[#allocation7 + $0x9]]  ;;  %v877_v40 = vstv %s2137_s4  ;;  %s1356_s4 = sshll.u32 %s1570_s18, 11 }
  0xb3   : > { %s2167_s11 = sld [smem:[#allocation7 + $0xa]]  ;;  %v902_v52 = vstv %s2139_s16  ;;  %s1032_s16 = sshll.u32 %s1727_s30, 4  ;;  %s2343_s16 = int_to_ptr.vmem [resolvable:$true] %s1032_s16 }
  0xb4   : > { %v927_v13 = vstv %s2143_s24  ;;  %s2231_s17 = sld [smem:[#allocation9 + $0x1e]]  ;;  %s1492_s22 = scalar_lea.vmem %s2343_s16, 2048 }
  0xb5   : > { %808 = vrot.lane.b32.xlu0 %v2075_v32, %s1584_s8  ;;  %s2101_s8 = sld [smem:[#allocation9 + $0x14]]  ;;  %v952_v30 = vstv %s2149_s5  ;;  %p1493_p11 = scmp.ne.s32.totalorder %s2343_s16, %s1492_s22 }
  0xb6   : > { %v977_v48 = vstv %s2155_s26  ;;  %s2233_s27 = sld [smem:[#allocation7 + $0xb]] }
  0xb7   : > { %v892_v10 = vstv %s2097_s21  ;;  %s2245_s12 = sld [smem:[#allocation9 + $0x3]] }
  0xb8   : > { %v794_v42 = vstv %s2161_s6  ;;  %s2255_s13 = sld [smem:[#allocation9 + $0x7]] }
  0xb9   : > { %v802_v45 = vstv %s2167_s11  ;;  %s2265_s7 = sld [smem:[#allocation9 + $0xb]] }
  0xba   : > { %s2267_s0 = sld [smem:[#allocation9 + $0xf]] }
  0xbb   : > { %v942_v26 = vstv %s2101_s8  ;;  %s2269_s1 = sld [smem:[#allocation9 + $0x13]]  ;;  %s1585_s8 = smov [#allocation10]  }
  0xbc   : > { %s2298_s2 = sld [smem:[#allocation9 + $0x17]]  ;;  %s1496_s29 = sshll.u32 %s1585_s8, 4  ;;  %s1497_s29 = int_to_ptr.vmem [resolvable:$false] %s1496_s29 }
  0xbd   : > { %s2300_s3 = sld [smem:[#allocation9 + $0x1b]]  ;;  %s1498_s9 = scalar_lea.vmem %s1497_s29, 4096 }
  0xbe   : > { %s2302_s15 = sld [smem:[#allocation9 + $0x1f]]  ;;  %p1499_p2 = scmp.lt.s32.totalorder %s2343_s16, %s1497_s29 }
  0xbf   : > { %s2446_s18 = sld [smem:[#allocation18_spill]]  ;;  %p1500_p3 = scmp.lt.s32.totalorder %s1498_s9, %s1492_s22 }
  0xc0   : > { %s2447_s23 = sld [smem:[#allocation30_spill]] }
  0xc1   : > { %s2448_s28 = sld [smem:[#allocation23_spill]]  ;;  %p1501_p5 = por %p1500_p3, %p1499_p2 }
  0xc5   : > { %s2449_s14 = sand.u32 1, %s2446_s18  }
  0xc6   : > { %s2341_s25 = scalar_lea.hbm %s2447_s23, %s1356_s4  ;;  %s2355_s21 = scalar_lea.sflag [#allocation5], %s2449_s14 }
  0xc7   : > { %p2450_p13 = scmp.ne.s32.totalorder %s2448_s28, 0 }
  0xc9   : > { %p1494_p1 = pnand %p1493_p11, %p2450_p13 }
  0xcb   : > { %p1495_p0 = pneg %p1494_p1 }
  0xcd   : > { %p1502_p6 = pnand %p1501_p5, %p1495_p0 }
  0xf5   : > { %v751_v50 = vpop.permute.xlu1 %750 }
  0xf6   : > { %v755_v59 = vmul.f32 %v754_v56, %v751_v50 }
  0xf8   : > { %v757_v36 = vadd.f32 %v755_v59, %v747_v60 }
  0xf9   : > { %v753_v21 = vpop.permute.xlu1 %752 }
  0xfa   : > { %v756_v11 = vmul.f32 %v754_v56, %v753_v21 }
  0xfc   : > { %v758_v53 = vadd.f32 %v756_v11, %v748_v0 }
 0x101   : > { %v727_v34 = vpop.permute.xlu0 %726 }
 0x102   : > { %v731_v4 = vmul.f32 %v730_v62, %v727_v34 }
 0x104   : > { %v733_v55 = vadd.f32 %v731_v4, %v723_v38 }
 0x106   : > { %v729_v20 = vpop.permute.xlu0 %728  ;;  %v739_v8 = vpop.permute.xlu1 %738 }
 0x107   : > { %v732_v12 = vmul.f32 %v730_v62, %v729_v20  ;;  %v742_v17 = vmul.f32 %v740_v51, %v739_v8 }
 0x109   : > { %v734_v41 = vadd.f32 %v732_v12, %v724_v43 }
 0x10a   : > { %v737_v6 = vpop.permute.xlu0 %736  ;;  %v763_v27 = vpop.permute.xlu1 %762 }
 0x10b   : > { %v744_v28 = vadd.f32 %v742_v17, %v734_v41  ;;  %v741_v7 = vmul.f32 %v740_v51, %v737_v6  ;;  %v766_v37 = vmul.f32 %v764_v19, %v763_v27 }
 0x10d   : > { %v820_v47 = vmul.f32 %v818_v33, %v744_v28  ;;  %v844_v50 = vmul.f32 %v842_v49, %v744_v28  ;;  %v743_v57 = vadd.f32 %v741_v7, %v733_v55  ;;  %v768_v16 = vadd.f32 %v766_v37, %v758_v53 }
 0x10e   : > { %v761_v39 = vpop.permute.xlu0 %760  ;;  %v777_v44 = vpop.permute.xlu1 %776  ;;  %v869_v34 = vmul.f32 %v867_v1, %v744_v28  ;;  %v894_v21 = vmul.f32 %v892_v10, %v744_v28  ;;  %v919_v56 = vmul.f32 %v917_v25, %v744_v28  ;;  %v944_v60 = vmul.f32 %v942_v26, %v744_v28 }
 0x10f   : > { %v969_v62 = vmul.f32 %v967_v2, %v744_v28  ;;  %v994_v38 = vmul.f32 %v992_v35, %v744_v28  ;;  %v765_v0 = vmul.f32 %v764_v19, %v761_v39  ;;  %v780_v43 = vmul.f32 %v778_v24, %v777_v44 }
 0x110   : > { %v819_v51 = vmul.f32 %v818_v33, %v743_v57  ;;  %v843_v20 = vmul.f32 %v842_v49, %v743_v57  ;;  %v868_v8 = vmul.f32 %v867_v1, %v743_v57  ;;  %v893_v12 = vmul.f32 %v892_v10, %v743_v57 }
 0x111   : > { %v824_v17 = vmul.f32 %v822_v58, %v768_v16  ;;  %v848_v14 = vmul.f32 %v846_v54, %v768_v16  ;;  %v873_v4 = vmul.f32 %v871_v22, %v768_v16  ;;  %v898_v11 = vmul.f32 %v896_v15, %v768_v16 }
 0x112   : > { %v923_v19 = vmul.f32 %v921_v61, %v768_v16  ;;  %v948_v33 = vmul.f32 %v946_v9, %v768_v16  ;;  %v973_v49 = vmul.f32 %v971_v46, %v768_v16  ;;  %v998_v1 = vmul.f32 %v996_v3, %v768_v16  ;;  %v787_v27 = vpop.permute.xlu1 %786 }
 0x113   : > { %v826_v10 = vadd.f32 %v824_v17, %v820_v47  ;;  %v850_v41 = vadd.f32 %v848_v14, %v844_v50  ;;  %v875_v59 = vadd.f32 %v873_v4, %v869_v34  ;;  %v900_v6 = vadd.f32 %v898_v11, %v894_v21 }
 0x114   : > { %v925_v28 = vadd.f32 %v923_v19, %v919_v56  ;;  %v950_v7 = vadd.f32 %v948_v33, %v944_v60  ;;  %v975_v37 = vadd.f32 %v973_v49, %v969_v62  ;;  %v1000_v55 = vadd.f32 %v998_v1, %v994_v38 }
 0x115   : > { %v918_v53 = vmul.f32 %v917_v25, %v743_v57  ;;  %v943_v39 = vmul.f32 %v942_v26, %v743_v57  ;;  %v968_v44 = vmul.f32 %v967_v2, %v743_v57  ;;  %v767_v47 = vadd.f32 %v765_v0, %v757_v36 }
 0x116   : > { %v993_v16 = vmul.f32 %v992_v35, %v743_v57  ;;  %v782_v34 = vadd.f32 %v780_v43, %v772_v18  ;;  %v790_v56 = vmul.f32 %v788_v23, %v787_v27  ;;  %v1002_v38 = vstv %s2231_s17 }
 0x117   : > { %v775_v50 = vpop.permute.xlu0 %774  ;;  %v823_v60 = vmul.f32 %v822_v58, %v767_v47  ;;  %v847_v25 = vmul.f32 %v846_v54, %v767_v47  ;;  %v872_v26 = vmul.f32 %v871_v22, %v767_v47  ;;  %v897_v62 = vmul.f32 %v896_v15, %v767_v47 }
 0x118   : > { %v779_v21 = vmul.f32 %v778_v24, %v775_v50  ;;  %v922_v2 = vmul.f32 %v921_v61, %v767_v47  ;;  %v947_v35 = vmul.f32 %v946_v9, %v767_v47  ;;  %v972_v18 = vmul.f32 %v971_v46, %v767_v47 }
 0x119   : > { %v997_v24 = vmul.f32 %v996_v3, %v767_v47  ;;  %v825_v58 = vadd.f32 %v823_v60, %v819_v51  ;;  %v849_v54 = vadd.f32 %v847_v25, %v843_v20  ;;  %v874_v22 = vadd.f32 %v872_v26, %v868_v8 }
 0x11a   : > { %v899_v15 = vadd.f32 %v897_v62, %v893_v12  ;;  %v924_v61 = vadd.f32 %v922_v2, %v918_v53  ;;  %v949_v9 = vadd.f32 %v947_v35, %v943_v39  ;;  %v974_v46 = vadd.f32 %v972_v18, %v968_v44 }
 0x11b   : > { %v785_v36 = vpop.permute.xlu0 %784  ;;  %v999_v3 = vadd.f32 %v997_v24, %v993_v16  ;;  %v792_v0 = vadd.f32 %v790_v56, %v782_v34  ;;  %v796_v43 = vmul.f32 %v794_v42, %v2064_v29  ;;  %v795_v51 = vmul.f32 %v794_v42, %v2075_v32 }
 0x11c   : > { %v801_v57 = vpop.permute.xlu1 %800  ;;  %v781_v20 = vadd.f32 %v779_v21, %v2179_v63  ;;  %v789_v8 = vmul.f32 %v788_v23, %v785_v36  ;;  %v812_v17 = vstv %s2233_s27  ;;  %v908_v16 = vstv %s2267_s0 }
 0x11d   : > { %v804_v12 = vmul.f32 %v802_v45, %v801_v57  ;;  %v830_v14 = vmul.f32 %v828_v5, %v792_v0  ;;  %v854_v4 = vmul.f32 %v852_v31, %v792_v0  ;;  %v879_v11 = vmul.f32 %v877_v40, %v792_v0 }
 0x11e   : > { %v904_v19 = vmul.f32 %v902_v52, %v792_v0  ;;  %v929_v29 = vmul.f32 %v927_v13, %v792_v0  ;;  %v954_v33 = vmul.f32 %v952_v30, %v792_v0  ;;  %v979_v32 = vmul.f32 %v977_v48, %v792_v0 }
 0x11f   : > { %v1004_v63 = vmul.f32 %v1002_v38, %v792_v0  ;;  %v832_v23 = vadd.f32 %v830_v14, %v826_v10  ;;  %v856_v42 = vadd.f32 %v854_v4, %v850_v41  ;;  %v881_v49 = vadd.f32 %v879_v11, %v875_v59 }
 0x120   : > { %v906_v1 = vadd.f32 %v904_v19, %v900_v6  ;;  %v811_v27 = vpop.permute.xlu1 %810  ;;  %v931_v53 = vadd.f32 %v929_v29, %v925_v28  ;;  %v956_v39 = vadd.f32 %v954_v33, %v950_v7  ;;  %v981_v44 = vadd.f32 %v979_v32, %v975_v37 }
 0x121   : > { %v1006_v47 = vadd.f32 %v1004_v63, %v1000_v55  ;;  %v791_v10 = vadd.f32 %v789_v8, %v781_v20  ;;  %v834_v41 = vstv %s2245_s12  ;;  %v858_v59 = vstv %s2255_s13 }
 0x122   : > { %v883_v6 = vstv %s2265_s7  ;;  %v806_v50 = vadd.f32 %v804_v12, %v796_v43  ;;  %v933_v34 = vstv %s2269_s1  ;;  %v814_v21 = vmul.f32 %v812_v17, %v811_v27 }
 0x123   : > { %v829_v56 = vmul.f32 %v828_v5, %v791_v10  ;;  %v853_v28 = vmul.f32 %v852_v31, %v791_v10  ;;  %v878_v7 = vmul.f32 %v877_v40, %v791_v10  ;;  %v903_v37 = vmul.f32 %v902_v52, %v791_v10  ;;  %v799_v55 = vpop.permute.xlu0 %798 }
 0x124   : > { %v928_v60 = vmul.f32 %v927_v13, %v791_v10  ;;  %v953_v25 = vmul.f32 %v952_v30, %v791_v10  ;;  %v978_v26 = vmul.f32 %v977_v48, %v791_v10  ;;  %v1003_v62 = vmul.f32 %v1002_v38, %v791_v10 }
 0x125   : > { %v831_v2 = vadd.f32 %v829_v56, %v825_v58  ;;  %v855_v5 = vadd.f32 %v853_v28, %v849_v54  ;;  %v880_v35 = vadd.f32 %v878_v7, %v874_v22  ;;  %v905_v31 = vadd.f32 %v903_v37, %v899_v15 }
 0x126   : > { %v930_v18 = vadd.f32 %v928_v60, %v924_v61  ;;  %v955_v24 = vadd.f32 %v953_v25, %v949_v9  ;;  %v980_v40 = vadd.f32 %v978_v26, %v974_v46  ;;  %v1005_v36 = vadd.f32 %v1003_v62, %v999_v3 }
 0x127   : > { %v803_v52 = vmul.f32 %v802_v45, %v799_v55  ;;  %v958_v57 = vstv %s2298_s2  ;;  %v983_v0 = vstv %s2300_s3  ;;  %v816_v43 = vadd.f32 %v814_v21, %v806_v50  ;;  %v809_v13 = vpop.permute.xlu0 %808 }
 0x128   : > { %v1008_v20 = vstv %s2302_s15  ;;  %v813_v30 = vmul.f32 %v812_v17, %v809_v13 }
 0x129   : > { %v805_v8 = vadd.f32 %v803_v52, %v795_v51  ;;  %v836_v48 = vmul.f32 %v834_v41, %v816_v43  ;;  %v860_v58 = vmul.f32 %v858_v59, %v816_v43  ;;  %v885_v54 = vmul.f32 %v883_v6, %v816_v43 }
 0x12a   : > { %v910_v22 = vmul.f32 %v908_v16, %v816_v43  ;;  %v935_v15 = vmul.f32 %v933_v34, %v816_v43  ;;  %v960_v61 = vmul.f32 %v958_v57, %v816_v43  ;;  %v985_v9 = vmul.f32 %v983_v0, %v816_v43 }
 0x12b   : > { %v838_v45 = vadd.f32 %v836_v48, %v832_v23  ;;  %v862_v46 = vadd.f32 %v860_v58, %v856_v42  ;;  %v887_v3 = vadd.f32 %v885_v54, %v881_v49  ;;  %v1010_v38 = vmul.f32 %v1008_v20, %v816_v43 }
 0x12c   : > { %v912_v51 = vadd.f32 %v910_v22, %v906_v1  ;;  %v937_v12 = vadd.f32 %v935_v15, %v931_v53  ;;  %v962_v17 = vadd.f32 %v960_v61, %v956_v39  ;;  %v987_v14 = vadd.f32 %v985_v9, %v981_v44 }
 0x12d   : > { %840 = vst [vmem:[%s1727_s30 + $0x8] sm:$0xff] %v838_v45  ;;  %1312 = vst [vmem:[%s1727_s30 + $0x18] sm:$0xff] %v862_v46  ;;  %v1012_v4 = vadd.f32 %v1010_v38, %v1006_v47  ;;  %v815_v11 = vadd.f32 %v813_v30, %v805_v8 }
 0x12e   : > { %1318 = vst [vmem:[%s1727_s30 + $0x28] sm:$0xff] %v887_v3  ;;  %1324 = vst [vmem:[%s1727_s30 + $0x38] sm:$0xff] %v912_v51 }
 0x12f   : > { %1330 = vst [vmem:[%s1727_s30 + $0x48] sm:$0xff] %v937_v12  ;;  %1336 = vst [vmem:[%s1727_s30 + $0x58] sm:$0xff] %v962_v17  ;;  %v835_v19 = vmul.f32 %v834_v41, %v815_v11  ;;  %v859_v29 = vmul.f32 %v858_v59, %v815_v11  ;;  %v884_v33 = vmul.f32 %v883_v6, %v815_v11 }
 0x130   : > { %1342 = vst [vmem:[%s1727_s30 + $0x68] sm:$0xff] %v987_v14  ;;  %1348 = vst [vmem:[%s1727_s30 + $0x78] sm:$0xff] %v1012_v4  ;;  %v909_v32 = vmul.f32 %v908_v16, %v815_v11  ;;  %v934_v63 = vmul.f32 %v933_v34, %v815_v11  ;;  %v959_v23 = vmul.f32 %v958_v57, %v815_v11 }
 0x131   : > { %v984_v42 = vmul.f32 %v983_v0, %v815_v11  ;;  %v1009_v49 = vmul.f32 %v1008_v20, %v815_v11  ;;  %v837_v1 = vadd.f32 %v835_v19, %v831_v2  ;;  %v861_v27 = vadd.f32 %v859_v29, %v855_v5 }
 0x132   : > { %v886_v53 = vadd.f32 %v884_v33, %v880_v35  ;;  %v911_v39 = vadd.f32 %v909_v32, %v905_v31  ;;  %v936_v44 = vadd.f32 %v934_v63, %v930_v18  ;;  %v961_v47 = vadd.f32 %v959_v23, %v955_v24 }
 0x133   : > { %v986_v10 = vadd.f32 %v984_v42, %v980_v40  ;;  %v1011_v41 = vadd.f32 %v1009_v49, %v1005_v36  ;;  %839 = vst [vmem:[%s1727_s30] sm:$0xff] %v837_v1  ;;  %1311 = vst [vmem:[%s1727_s30 + $0x10] sm:$0xff] %v861_v27 }
 0x134   : > { %1317 = vst [vmem:[%s1727_s30 + $0x20] sm:$0xff] %v886_v53  ;;  %1323 = vst [vmem:[%s1727_s30 + $0x30] sm:$0xff] %v911_v39 }
 0x135   : > { %1329 = vst [vmem:[%s1727_s30 + $0x40] sm:$0xff] %v936_v44  ;;  %1335 = vst [vmem:[%s1727_s30 + $0x50] sm:$0xff] %v961_v47 }
 0x136   : > { %1341 = vst [vmem:[%s1727_s30 + $0x60] sm:$0xff] %v986_v10  ;;  %1347 = vst [vmem:[%s1727_s30 + $0x70] sm:$0xff] %v1011_v41 }
 0x137   : > { %1505 = shalt.err (!%p1502_p6)
}
 0x138   : > { %s1506_s30 = scalar_lea.hbm %s2341_s25, 2048  ;;  %s1510_s5 = scalar_lea.hbm %s2447_s23, 4096 }
 0x139   : > { %p1507_p7 = scmp.ne.s32.totalorder %s2341_s25, %s1506_s30  ;;  %p1511_p12 = scmp.lt.s32.totalorder %s2341_s25, %s2447_s23 }
 0x13a   : > { %p1512_p4 = scmp.lt.s32.totalorder %s1510_s5, %s1506_s30 }
 0x13b   : > { %p1508_p9 = pnand %p1507_p7, %p2450_p13 }
 0x13c   : > { %p1513_p10 = por %p1512_p4, %p1511_p12 }
 0x13d   : > { %p1509_p8 = pneg %p1508_p9 }
 0x13f   : > { %p1514_p11 = pnand %p1513_p10, %p1509_p8 }
 0x141   : > { %1517 = shalt.err (!%p1514_p11)
}
 0x142   : > { %s1586_s11 = smov 128   ;;  %s1587_s17 = smov 8  }
 0x143   : > { %1369 = dma.vmem_to_hbm [thread:$0]  (%p2450_p13), %s2343_s16, 2048, %s2341_s25, %s2355_s21, %s1586_s11, %s1586_s11, %s1587_s17  }
 0x144 PF: > { %s2451_s27 = sld [smem:[#allocation21_spill]] }
 0x145   : > { %s2452_s12 = sld [smem:[#allocation17_spill]] }
 0x146   : > { %s2453_s13 = sld [smem:[#allocation24_spill]] }
 0x14a   : > { %p1391_p1 = scmp.ge.s32.totalorder %s2451_s27, 2 }
 0x14b   : > { %s1047_s7 = sand.u32 1, %s2452_s12  }
 0x14c   : > { %p2454_p0 = scmp.ne.s32.totalorder %s2453_s13, 0  ;;  %s1048_s0 = scalar_lea.sflag [#allocation5], %s1047_s7 }
 0x14e   : > { %p1382_p2 = pnand %p1391_p1, %p2454_p0 }
 0x150   : > { %p1383_p3 = pneg %p1382_p2 }
 0x152   : > { %1553 = dma.done.wait (%p1383_p3), %s1048_s0, 2048  }
 0x153   : > { %1555 = vsyncadd (%p1383_p3), %s1048_s0, 4294965248  ;;  %s19_s20 = sadd.s32 1, %s2451_s27   ;;  %s2455_s15 = sld [smem:[#allocation18_spill]] }
 0x154   : > { %p16_p5 = scmp.ge.s32.totalorder %s19_s20, 4   ;;  %s2456_s16 = sld [smem:[#allocation19_spill]] }
 0x155   : > { %s2457_s17 = sld [smem:[#allocation25_spill]] }
 0x156   : > { %s2458_s18 = sld [smem:[#allocation20_spill]]  ;;  %18 = sbr.rel (!%p16_p5) target bundleno = 12 (0xc), region = 204 }
 0x157   : > { %s2459_s19 = sld [smem:[#allocation22_spill]] }
 0x15b   :  { %1053 = vsyncpa [#allocation5], 1 }
 0x15c   :  { %1055 = vsyncpa [#allocation5 + $0x1], 1 }
 0x15d   :  { %1056 = vsyncpa [#allocation6], 1 }
 0x15e   :  { %1058 = vsyncpa [#allocation6 + $0x1], 1 }
 0x15f   :  { %1059 = vsyncpa [#allocation8], 1 }
 0x160   :  { %1060 = vsyncmov [#allocation3] }
 0x163   :  { %s1061_s1 = vpop.sfrf %1060 }
 0x164   :  { %p1354_p13 = scmp.ne.s32.totalorder %s1061_s1, 0 }
 0x166   :  { %1065 = shalt.err (%p1354_p13)  }
 0x167   :  { %1067 = vsyncmov [#allocation3 + $0x1] }
 0x16a   :  { %s1068_s2 = vpop.sfrf %1067 }
 0x16b   :  { %p1355_p6 = scmp.ne.s32.totalorder %s1068_s2, 0 }
 0x16d   :  { %1072 = shalt.err (%p1355_p6)  }

</bundles_post_ra>
